<compile_context>
chip_gen: v6e
topology: v6e:2x2x1
jax: 0.10.0
libtpu: 0.0.40
codegen_flags: <defaults>
</compile_context>

<pallas_src>
import numpy as np

import jax
import jax.numpy as jnp
from jax.experimental import pallas as pl
from jax.experimental.pallas import tpu as pltpu


# ----------------------------- weight packing --------------------------------

class _Packer:
    """Packs many small f32 blocks into one (rows, 128) buffer (one DMA)."""

    def __init__(self, lanes=128):
        self.lanes = lanes
        self._blocks = []
        self.offsets = {}
        self._row = 0

    def add(self, name, arr):
        arr = np.asarray(arr, np.float32)
        assert arr.ndim == 2 and arr.shape[1] <= self.lanes, (name, arr.shape)
        pad = -self._row % 8                       # 8-sublane align each block
        if pad:
            self._blocks.append(np.zeros((pad, self.lanes), np.float32))
            self._row += pad
        buf = np.zeros((arr.shape[0], self.lanes), np.float32)
        buf[:, :arr.shape[1]] = arr
        self.offsets[name] = (self._row, arr.shape[0], arr.shape[1])
        self._blocks.append(buf)
        self._row += arr.shape[0]

    def finalize(self):
        pad = -self._row % 8
        if pad:
            self._blocks.append(np.zeros((pad, self.lanes), np.float32))
            self._row += pad
        return np.concatenate(self._blocks, axis=0)


def _pad2(a, rows, cols):
    out = np.zeros((rows, cols), np.float32)
    a = np.asarray(a, np.float32)
    out[:a.shape[0], :a.shape[1]] = a
    return out


# ------------------------------- forward builder ------------------------------

def make_forward(params, in_chan, out_chan, imsize, batch, kernel_size=5):
    ks = kernel_size
    C1, C2 = 6, 16
    B = batch
    H = W = imsize
    Hp1 = H + 2                                   # y-padded rows per image
    Ho1, Wo1 = Hp1 - ks + 1, (W + 2) - ks + 1     # conv1 out spatial (pad=1)
    Hq1, Wq1 = Ho1 // 2, Wo1 // 2                 # pool1 (floor)
    Hp2 = Hq1 + 2                                 # y-padded pooled rows/image
    Ho2, Wo2 = Hp2 - ks + 1, (Wq1 + 2) - ks + 1   # conv2 out spatial (pad=1)
    Hq2, Wq2 = Ho2 // 2, Wo2 // 2                 # pool2 (floor)

    K1 = W * in_chan                              # conv1 input lanes (w*Cin+c)
    N1 = Wo1 * C1                                 # conv1 output lanes (x*C1+c)
    K2 = N1 - C1                                  # sparse-pooled lanes -> conv2
    N2 = Wo2 * C2                                 # conv2 output lanes (x*C2+c)
    K3 = N2 - C2                                  # sparse-pooled lanes -> fc1
    R1 = B * Hp1                                  # conv1 matmul M
    R2 = B * Hp2                                  # conv2 matmul M
    NP = 128                                      # padded MLP lane width
    MP = max(8, -(-B // 8) * 8)                   # padded MLP row count
    flat_dim = C2 * Hq2 * Wq2

    w1 = np.asarray(params["c1w"], np.float32)
    w2 = np.asarray(params["c2w"], np.float32)
    f1w = np.asarray(params["f1w"], np.float32)
    assert f1w.shape[1] == flat_dim

    # conv1 band: input lane = w*Cin + ci (un-padded x); x-pad folded in.
    band1 = np.zeros((ks, K1, N1), np.float32)
    for dy in range(ks):
        for xo in range(Wo1):
            for dx in range(ks):
                u = xo + dx - 1
                if 0 <= u < W:
                    band1[dy, u * in_chan:(u + 1) * in_chan,
                          xo * C1:(xo + 1) * C1] = w1[:, :, dy, dx].T

    # conv2 band: input lane = 2*u*C1 + c (sparse pooled layout); x-pad folded
    # in by dropping out-of-range rows; odd-x "garbage" lanes get zero weight.
    band2 = np.zeros((ks, K2, N2), np.float32)
    for dy in range(ks):
        for xo in range(Wo2):
            for dx in range(ks):
                u = xo + dx - 1
                if 0 <= u < Wq1:
                    band2[dy, 2 * u * C1:(2 * u + 1) * C1,
                          xo * C2:(xo + 1) * C2] = w2[:, :, dy, dx].T

    # pool1-row selection + conv2 y-pad (zero rows) as one 0/1 matrix; it also
    # drops the cross-image garbage rows of the batched-in-M conv1 output.
    sel1 = np.zeros((R2 + ks - 1, R1 - 1), np.float32)
    for b in range(B):
        for v in range(1, Hq1 + 1):
            sel1[b * Hp2 + v, b * Hp1 + 2 * (v - 1)] = 1.0

    # pool2-row selection (one 0/1 matrix per pooled y); the torch flatten
    # order (c, y, x) is folded into the fc1 weight splits w1_{yq}.
    sel_y = np.zeros((Hq2, MP, R2 - 1), np.float32)
    w1y = np.zeros((Hq2, K3, NP), np.float32)
    for yq in range(Hq2):
        for b in range(B):
            sel_y[yq, b, b * Hp2 + 2 * yq] = 1.0
        for xq in range(Wq2):
            for c in range(C2):
                w1y[yq, 2 * xq * C2 + c, :f1w.shape[0]] = \
                    f1w[:, (c * Hq2 + yq) * Wq2 + xq]

    pk = _Packer(NP)
    for dy in range(ks):
        pk.add(f"band1_{dy}", band1[dy])
        pk.add(f"band2_{dy}", band2[dy])
    pk.add("bias1", np.tile(np.asarray(params["c1b"], np.float32), Wo1)[None, :])
    pk.add("bias2", np.tile(np.asarray(params["c2b"], np.float32), Wo2)[None, :])
    pk.add("sel1", sel1)
    for yq in range(Hq2):
        pk.add(f"sely_{yq}", sel_y[yq])
        pk.add(f"w1_{yq}", w1y[yq])
    pk.add("b1", _pad2(np.asarray(params["f1b"], np.float32)[None, :], 1, NP))
    pk.add("w2", _pad2(np.asarray(params["f2w"], np.float32).T, NP, NP))
    pk.add("b2", _pad2(np.asarray(params["f2b"], np.float32)[None, :], 1, NP))
    pk.add("w3", _pad2(np.asarray(params["f3w"], np.float32).T, NP, NP))
    pk.add("b3", _pad2(np.asarray(params["f3b"], np.float32)[None, :], 1, NP))
    offsets = pk.offsets
    wpack = jnp.asarray(pk.finalize())            # ONE packed weight buffer
    wrows = wpack.shape[0]
    xrows = R1 + ks - 1                           # input slab rows (tail-padded)

    # --------------------------- fused Pallas kernel ---------------------------

    def kernel(x_ref, w_ref, o_ref):
        def blk(name):
            off, r, c = offsets[name]
            return w_ref[off:off + r, :c]

        # conv1 + bias + ReLU (batch folded into M: rows = b*Hp1 + y).
        # Feeds stay f32 for the 1e-3 gate; bf16 cast here is the v5e/v6e/v7x
        # MXU upgrade once tolerance allows.
        acc = jnp.zeros((R1, N1), jnp.float32)
        for dy in range(ks):
            acc = acc + jnp.dot(x_ref[dy:dy + R1, :], blk(f"band1_{dy}"),
                                preferred_element_type=jnp.float32)
        a1 = jnp.maximum(acc + blk("bias1"), 0.0)                 # (R1, N1)

        # 2x2 max-pool (floor): adjacent-row max + adjacent-x max, contiguous
        # slices only.  Row compaction + conv2 y-pad = the sel1 0/1 matmul;
        # lane compaction is folded into band2's zeroed rows.
        m1 = jnp.maximum(a1[:R1 - 1, :], a1[1:, :])               # (R1-1, N1)
        m1 = jnp.maximum(m1[:, :K2], m1[:, C1:C1 + K2])           # (R1-1, K2)
        p1 = jnp.dot(blk("sel1"), m1,
                     preferred_element_type=jnp.float32)          # (R2+ks-1, K2)

        # conv2 + bias + ReLU (rows = b*Hp2 + y).
        acc2 = jnp.zeros((R2, N2), jnp.float32)
        for dy in range(ks):
            acc2 = acc2 + jnp.dot(p1[dy:dy + R2, :], blk(f"band2_{dy}"),
                                  preferred_element_type=jnp.float32)
        a2 = jnp.maximum(acc2 + blk("bias2"), 0.0)                # (R2, N2)

        # 2x2 max-pool again, compaction-free.
        m2 = jnp.maximum(a2[:R2 - 1, :], a2[1:, :])               # (R2-1, N2)
        m2 = jnp.maximum(m2[:, :K3], m2[:, C2:C2 + K3])           # (R2-1, K3)

        # flatten + fc1: pooled-row selection via 0/1 matmuls; flatten order
        # folded into w1_{yq}.  MLP rows padded to MP=8, lanes to 128.
        h = blk("b1")                                             # (1, NP)
        for yq in range(Hq2):
            ry = jnp.dot(blk(f"sely_{yq}"), m2,
                         preferred_element_type=jnp.float32)      # (MP, K3)
            h = h + jnp.dot(ry, blk(f"w1_{yq}"),
                            preferred_element_type=jnp.float32)
        h = jnp.maximum(h, 0.0)
        h = jnp.maximum(jnp.dot(h, blk("w2"),
                                preferred_element_type=jnp.float32)
                        + blk("b2"), 0.0)
        # TODO(synk): nn.Dropout(p=0.5) is identity in eval mode; training-mode
        # stochastic dropout (pltpu.prng_random_bits mask) intentionally omitted.
        o = jnp.dot(h, blk("w3"), preferred_element_type=jnp.float32) + blk("b3")
        o_ref[...] = o.astype(o_ref.dtype)                        # (MP, NP) store

    # ------------------------------- wrapper ----------------------------------

    @jax.jit
    def _forward(x, wp):
        assert x.shape[0] == B
        # TODO(synk): the NCHW->channels-last relayout + y-pad stays as one tiny
        # fused XLA op; it cannot be folded into band1 without a transpose anyway.
        xr = jnp.transpose(x, (0, 2, 3, 1)).astype(jnp.float32)    # (B,H,W,Cin)
        xr = jnp.pad(xr, ((0, 0), (1, 1), (0, 0), (0, 0)))         # y-pad = 1
        xr = xr.reshape(B * Hp1, K1)
        xr = jnp.pad(xr, ((0, ks - 1), (0, 0)))                    # slab tail rows
        out = pl.pallas_call(
            kernel,
            grid=(1,),
            out_shape=jax.ShapeDtypeStruct((MP, NP), jnp.float32),
            in_specs=[pl.BlockSpec((xrows, K1), lambda i: (0, 0)),
                      pl.BlockSpec((wrows, NP), lambda i: (0, 0))],
            out_specs=pl.BlockSpec((MP, NP), lambda i: (0, 0)),
            compiler_params=pltpu.CompilerParams(
                dimension_semantics=("arbitrary",)),
        )(xr, wp)
        return out[:B, :out_chan]

    def forward(x):
        return _forward(x, wpack)

    return forward


# --------------------------------- params ------------------------------------

def init_params(key, in_chan, out_chan, imsize, kernel_size=5):
    z = 0.5 * (imsize - 2)
    z = int(0.5 * (z - 2))
    flat = 16 * z * z
    ks = jax.random.split(key, 10)

    def w(k, shape, fan_in):
        return jax.random.normal(k, shape, jnp.float32) / jnp.sqrt(fan_in)

    return dict(
        c1w=w(ks[0], (6, in_chan, kernel_size, kernel_size),
              in_chan * kernel_size ** 2),
        c1b=0.01 * jax.random.normal(ks[1], (6,), jnp.float32),
        c2w=w(ks[2], (16, 6, kernel_size, kernel_size), 6 * kernel_size ** 2),
        c2b=0.01 * jax.random.normal(ks[3], (16,), jnp.float32),
        f1w=w(ks[4], (120, flat), flat),
        f1b=0.01 * jax.random.normal(ks[5], (120,), jnp.float32),
        f2w=w(ks[6], (84, 120), 120),
        f2b=0.01 * jax.random.normal(ks[7], (84,), jnp.float32),
        f3w=w(ks[8], (out_chan, 84), 84),
        f3b=0.01 * jax.random.normal(ks[9], (out_chan,), jnp.float32),
    )


# ----------------------------- pure-JAX reference -----------------------------

def _ref_maxpool(x):
    B, C, H, W = x.shape
    H2, W2 = H // 2, W // 2
    xr = x[:, :, :2 * H2, :2 * W2].reshape(B, C, H2, 2, W2, 2)
    return xr.max(axis=(3, 5))


def ref_forward(x, p):
    dn = ("NCHW", "OIHW", "NCHW")
    y = jax.lax.conv_general_dilated(x, p["c1w"], (1, 1), ((1, 1), (1, 1)),
                                     dimension_numbers=dn)
    y = jnp.maximum(y + p["c1b"][None, :, None, None], 0.0)
    y = _ref_maxpool(y)
    y = jax.lax.conv_general_dilated(y, p["c2w"], (1, 1), ((1, 1), (1, 1)),
                                     dimension_numbers=dn)
    y = jnp.maximum(y + p["c2b"][None, :, None, None], 0.0)
    y = _ref_maxpool(y)
    flat = y.reshape(y.shape[0], -1)
    h = jnp.maximum(flat @ p["f1w"].T + p["f1b"], 0.0)
    h = jnp.maximum(h @ p["f2w"].T + p["f2b"], 0.0)
    return h @ p["f3w"].T + p["f3b"]


# ------------------------------------ main ------------------------------------

if __name__ == "__main__":
    B, in_chan, out_chan, imsize = 2, 4, 10, 16
    key = jax.random.PRNGKey(0)
    k_x, k_p = jax.random.split(key)
    x = jax.random.normal(k_x, (B, in_chan, imsize, imsize), jnp.float32)
    params = init_params(k_p, in_chan, out_chan, imsize)

    forward = make_forward(params, in_chan, out_chan, imsize, batch=B)
    out = jax.block_until_ready(forward(x))
    ref = jax.block_until_ready(ref_forward(x, params))

    assert out.shape == (B, out_chan), out.shape
    err = float(jnp.max(jnp.abs(out - ref)))
    assert jnp.allclose(out, ref, rtol=1e-3, atol=1e-3), f"max abs err {err}"
    print("KERNEL_OK")
</pallas_src>

<mosaic_0001>
module attributes {stable_mosaic.version = 11 : i64} {
  func.func @kernel(%arg0: i32, %arg1: memref<40x64xf32, #tpu.memory_space<vmem>>, %arg2: memref<1184x128xf32, #tpu.memory_space<vmem>>, %arg3: memref<8x128xf32, #tpu.memory_space<vmem>>) attributes {dimension_semantics = [#tpu.dimension_semantics<arbitrary>], iteration_bounds = array<i64: 1>, scalar_prefetch = 0 : i64, scratch_operands = 0 : i64, tpu.core_type = #tpu.core_type<tc>, window_params = [{pipeline_mode = #tpu.pipeline_mode<synchronous>, transform_indices = @transform_0, window_bounds = array<i64: 40, 64>}, {pipeline_mode = #tpu.pipeline_mode<synchronous>, transform_indices = @transform_1, window_bounds = array<i64: 1184, 128>}, {pipeline_mode = #tpu.pipeline_mode<synchronous>, transform_indices = @transform_2, window_bounds = array<i64: 8, 128>}]} {
    %cst = arith.constant 0.000000e+00 : f32
    %0 = vector.broadcast %cst : f32 to vector<36x84xf32>
    %c0 = arith.constant 0 : index
    %c0_0 = arith.constant 0 : index
    %1 = vector.load %arg1[%c0, %c0_0] : memref<40x64xf32, #tpu.memory_space<vmem>>, vector<36x64xf32>
    %c0_1 = arith.constant 0 : index
    %c0_2 = arith.constant 0 : index
    %2 = vector.load %arg2[%c0_1, %c0_2] : memref<1184x128xf32, #tpu.memory_space<vmem>>, vector<64x84xf32>
    %cst_3 = arith.constant dense<0.000000e+00> : vector<36x84xf32>
    %3 = tpu.matmul %1, %2, %cst_3 {dimension_numbers = #tpu.dot_dimension_numbers<[1], [0], [0], [1], [0, 0, 1, 1], [], []>} : vector<36x64xf32>, vector<64x84xf32>, vector<36x84xf32> -> vector<36x84xf32>
    %4 = arith.addf %0, %3 : vector<36x84xf32>
    %c1 = arith.constant 1 : index
    %c0_4 = arith.constant 0 : index
    %5 = vector.load %arg1[%c1, %c0_4] : memref<40x64xf32, #tpu.memory_space<vmem>>, vector<36x64xf32>
    %c144 = arith.constant 144 : index
    %c0_5 = arith.constant 0 : index
    %6 = vector.load %arg2[%c144, %c0_5] : memref<1184x128xf32, #tpu.memory_space<vmem>>, vector<64x84xf32>
    %cst_6 = arith.constant dense<0.000000e+00> : vector<36x84xf32>
    %7 = tpu.matmul %5, %6, %cst_6 {dimension_numbers = #tpu.dot_dimension_numbers<[1], [0], [0], [1], [0, 0, 1, 1], [], []>} : vector<36x64xf32>, vector<64x84xf32>, vector<36x84xf32> -> vector<36x84xf32>
    %8 = arith.addf %4, %7 : vector<36x84xf32>
    %c2 = arith.constant 2 : index
    %c0_7 = arith.constant 0 : index
    %9 = vector.load %arg1[%c2, %c0_7] : memref<40x64xf32, #tpu.memory_space<vmem>>, vector<36x64xf32>
    %c288 = arith.constant 288 : index
    %c0_8 = arith.constant 0 : index
    %10 = vector.load %arg2[%c288, %c0_8] : memref<1184x128xf32, #tpu.memory_space<vmem>>, vector<64x84xf32>
    %cst_9 = arith.constant dense<0.000000e+00> : vector<36x84xf32>
    %11 = tpu.matmul %9, %10, %cst_9 {dimension_numbers = #tpu.dot_dimension_numbers<[1], [0], [0], [1], [0, 0, 1, 1], [], []>} : vector<36x64xf32>, vector<64x84xf32>, vector<36x84xf32> -> vector<36x84xf32>
    %12 = arith.addf %8, %11 : vector<36x84xf32>
    %c3 = arith.constant 3 : index
    %c0_10 = arith.constant 0 : index
    %13 = vector.load %arg1[%c3, %c0_10] : memref<40x64xf32, #tpu.memory_space<vmem>>, vector<36x64xf32>
    %c432 = arith.constant 432 : index
    %c0_11 = arith.constant 0 : index
    %14 = vector.load %arg2[%c432, %c0_11] : memref<1184x128xf32, #tpu.memory_space<vmem>>, vector<64x84xf32>
    %cst_12 = arith.constant dense<0.000000e+00> : vector<36x84xf32>
    %15 = tpu.matmul %13, %14, %cst_12 {dimension_numbers = #tpu.dot_dimension_numbers<[1], [0], [0], [1], [0, 0, 1, 1], [], []>} : vector<36x64xf32>, vector<64x84xf32>, vector<36x84xf32> -> vector<36x84xf32>
    %16 = arith.addf %12, %15 : vector<36x84xf32>
    %c4 = arith.constant 4 : index
    %c0_13 = arith.constant 0 : index
    %17 = vector.load %arg1[%c4, %c0_13] : memref<40x64xf32, #tpu.memory_space<vmem>>, vector<36x64xf32>
    %c576 = arith.constant 576 : index
    %c0_14 = arith.constant 0 : index
    %18 = vector.load %arg2[%c576, %c0_14] : memref<1184x128xf32, #tpu.memory_space<vmem>>, vector<64x84xf32>
    %cst_15 = arith.constant dense<0.000000e+00> : vector<36x84xf32>
    %19 = tpu.matmul %17, %18, %cst_15 {dimension_numbers = #tpu.dot_dimension_numbers<[1], [0], [0], [1], [0, 0, 1, 1], [], []>} : vector<36x64xf32>, vector<64x84xf32>, vector<36x84xf32> -> vector<36x84xf32>
    %20 = arith.addf %16, %19 : vector<36x84xf32>
    %c720 = arith.constant 720 : index
    %c0_16 = arith.constant 0 : index
    %21 = vector.load %arg2[%c720, %c0_16] : memref<1184x128xf32, #tpu.memory_space<vmem>>, vector<1x84xf32>
    %22 = vector.broadcast %21 : vector<1x84xf32> to vector<36x84xf32>
    %23 = arith.addf %20, %22 : vector<36x84xf32>
    %cst_17 = arith.constant 0.000000e+00 : f32
    %24 = vector.broadcast %cst_17 : f32 to vector<36x84xf32>
    %25 = arith.maximumf %23, %24 : vector<36x84xf32>
    %26 = vector.extract_strided_slice %25 {offsets = [0, 0], sizes = [35, 84], strides = [1, 1]} : vector<36x84xf32> to vector<35x84xf32>
    %27 = vector.extract_strided_slice %25 {offsets = [1, 0], sizes = [35, 84], strides = [1, 1]} : vector<36x84xf32> to vector<35x84xf32>
    %28 = arith.maximumf %26, %27 : vector<35x84xf32>
    %29 = vector.extract_strided_slice %28 {offsets = [0, 0], sizes = [35, 78], strides = [1, 1]} : vector<35x84xf32> to vector<35x78xf32>
    %30 = vector.extract_strided_slice %28 {offsets = [0, 6], sizes = [35, 78], strides = [1, 1]} : vector<35x84xf32> to vector<35x78xf32>
    %31 = arith.maximumf %29, %30 : vector<35x78xf32>
    %c736 = arith.constant 736 : index
    %c0_18 = arith.constant 0 : index
    %32 = vector.load %arg2[%c736, %c0_18] : memref<1184x128xf32, #tpu.memory_space<vmem>>, vector<22x35xf32>
    %cst_19 = arith.constant dense<0.000000e+00> : vector<22x78xf32>
    %33 = tpu.matmul %32, %31, %cst_19 {dimension_numbers = #tpu.dot_dimension_numbers<[1], [0], [0], [1], [0, 0, 1, 1], [], []>} : vector<22x35xf32>, vector<35x78xf32>, vector<22x78xf32> -> vector<22x78xf32>
    %cst_20 = arith.constant 0.000000e+00 : f32
    %34 = vector.broadcast %cst_20 : f32 to vector<18x80xf32>
    %35 = vector.extract_strided_slice %33 {offsets = [0, 0], sizes = [18, 78], strides = [1, 1]} : vector<22x78xf32> to vector<18x78xf32>
    %c64 = arith.constant 64 : index
    %c0_21 = arith.constant 0 : index
    %36 = vector.load %arg2[%c64, %c0_21] : memref<1184x128xf32, #tpu.memory_space<vmem>>, vector<78x80xf32>
    %cst_22 = arith.constant dense<0.000000e+00> : vector<18x80xf32>
    %37 = tpu.matmul %35, %36, %cst_22 {dimension_numbers = #tpu.dot_dimension_numbers<[1], [0], [0], [1], [0, 0, 1, 1], [], []>} : vector<18x78xf32>, vector<78x80xf32>, vector<18x80xf32> -> vector<18x80xf32>
    %38 = arith.addf %34, %37 : vector<18x80xf32>
    %39 = vector.extract_strided_slice %33 {offsets = [1, 0], sizes = [18, 78], strides = [1, 1]} : vector<22x78xf32> to vector<18x78xf32>
    %c208 = arith.constant 208 : index
    %c0_23 = arith.constant 0 : index
    %40 = vector.load %arg2[%c208, %c0_23] : memref<1184x128xf32, #tpu.memory_space<vmem>>, vector<78x80xf32>
    %cst_24 = arith.constant dense<0.000000e+00> : vector<18x80xf32>
    %41 = tpu.matmul %39, %40, %cst_24 {dimension_numbers = #tpu.dot_dimension_numbers<[1], [0], [0], [1], [0, 0, 1, 1], [], []>} : vector<18x78xf32>, vector<78x80xf32>, vector<18x80xf32> -> vector<18x80xf32>
    %42 = arith.addf %38, %41 : vector<18x80xf32>
    %43 = vector.extract_strided_slice %33 {offsets = [2, 0], sizes = [18, 78], strides = [1, 1]} : vector<22x78xf32> to vector<18x78xf32>
    %c352 = arith.constant 352 : index
    %c0_25 = arith.constant 0 : index
    %44 = vector.load %arg2[%c352, %c0_25] : memref<1184x128xf32, #tpu.memory_space<vmem>>, vector<78x80xf32>
    %cst_26 = arith.constant dense<0.000000e+00> : vector<18x80xf32>
    %45 = tpu.matmul %43, %44, %cst_26 {dimension_numbers = #tpu.dot_dimension_numbers<[1], [0], [0], [1], [0, 0, 1, 1], [], []>} : vector<18x78xf32>, vector<78x80xf32>, vector<18x80xf32> -> vector<18x80xf32>
    %46 = arith.addf %42, %45 : vector<18x80xf32>
    %47 = vector.extract_strided_slice %33 {offsets = [3, 0], sizes = [18, 78], strides = [1, 1]} : vector<22x78xf32> to vector<18x78xf32>
    %c496 = arith.constant 496 : index
    %c0_27 = arith.constant 0 : index
    %48 = vector.load %arg2[%c496, %c0_27] : memref<1184x128xf32, #tpu.memory_space<vmem>>, vector<78x80xf32>
    %cst_28 = arith.constant dense<0.000000e+00> : vector<18x80xf32>
    %49 = tpu.matmul %47, %48, %cst_28 {dimension_numbers = #tpu.dot_dimension_numbers<[1], [0], [0], [1], [0, 0, 1, 1], [], []>} : vector<18x78xf32>, vector<78x80xf32>, vector<18x80xf32> -> vector<18x80xf32>
    %50 = arith.addf %46, %49 : vector<18x80xf32>
    %51 = vector.extract_strided_slice %33 {offsets = [4, 0], sizes = [18, 78], strides = [1, 1]} : vector<22x78xf32> to vector<18x78xf32>
    %c640 = arith.constant 640 : index
    %c0_29 = arith.constant 0 : index
    %52 = vector.load %arg2[%c640, %c0_29] : memref<1184x128xf32, #tpu.memory_space<vmem>>, vector<78x80xf32>
    %cst_30 = arith.constant dense<0.000000e+00> : vector<18x80xf32>
    %53 = tpu.matmul %51, %52, %cst_30 {dimension_numbers = #tpu.dot_dimension_numbers<[1], [0], [0], [1], [0, 0, 1, 1], [], []>} : vector<18x78xf32>, vector<78x80xf32>, vector<18x80xf32> -> vector<18x80xf32>
    %54 = arith.addf %50, %53 : vector<18x80xf32>
    %c728 = arith.constant 728 : index
    %c0_31 = arith.constant 0 : index
    %55 = vector.load %arg2[%c728, %c0_31] : memref<1184x128xf32, #tpu.memory_space<vmem>>, vector<1x80xf32>
    %56 = vector.broadcast %55 : vector<1x80xf32> to vector<18x80xf32>
    %57 = arith.addf %54, %56 : vector<18x80xf32>
    %cst_32 = arith.constant 0.000000e+00 : f32
    %58 = vector.broadcast %cst_32 : f32 to vector<18x80xf32>
    %59 = arith.maximumf %57, %58 : vector<18x80xf32>
    %60 = vector.extract_strided_slice %59 {offsets = [0, 0], sizes = [17, 80], strides = [1, 1]} : vector<18x80xf32> to vector<17x80xf32>
    %61 = vector.extract_strided_slice %59 {offsets = [1, 0], sizes = [17, 80], strides = [1, 1]} : vector<18x80xf32> to vector<17x80xf32>
    %62 = arith.maximumf %60, %61 : vector<17x80xf32>
    %63 = vector.extract_strided_slice %62 {offsets = [0, 0], sizes = [17, 64], strides = [1, 1]} : vector<17x80xf32> to vector<17x64xf32>
    %64 = vector.extract_strided_slice %62 {offsets = [0, 16], sizes = [17, 64], strides = [1, 1]} : vector<17x80xf32> to vector<17x64xf32>
    %65 = arith.maximumf %63, %64 : vector<17x64xf32>
    %c904 = arith.constant 904 : index
    %c0_33 = arith.constant 0 : index
    %66 = vector.load %arg2[%c904, %c0_33] : memref<1184x128xf32, #tpu.memory_space<vmem>>, vector<1x128xf32>
    %c760 = arith.constant 760 : index
    %c0_34 = arith.constant 0 : index
    %67 = vector.load %arg2[%c760, %c0_34] : memref<1184x128xf32, #tpu.memory_space<vmem>>, vector<8x17xf32>
    %cst_35 = arith.constant dense<0.000000e+00> : vector<8x64xf32>
    %68 = tpu.matmul %67, %65, %cst_35 {dimension_numbers = #tpu.dot_dimension_numbers<[1], [0], [0], [1], [0, 0, 1, 1], [], []>} : vector<8x17xf32>, vector<17x64xf32>, vector<8x64xf32> -> vector<8x64xf32>
    %c768 = arith.constant 768 : index
    %c0_36 = arith.constant 0 : index
    %69 = vector.load %arg2[%c768, %c0_36] : memref<1184x128xf32, #tpu.memory_space<vmem>>, vector<64x128xf32>
    %cst_37 = arith.constant dense<0.000000e+00> : vector<8x128xf32>
    %70 = tpu.matmul %68, %69, %cst_37 {dimension_numbers = #tpu.dot_dimension_numbers<[1], [0], [0], [1], [0, 0, 1, 1], [], []>} : vector<8x64xf32>, vector<64x128xf32>, vector<8x128xf32> -> vector<8x128xf32>
    %71 = vector.broadcast %66 : vector<1x128xf32> to vector<8x128xf32>
    %72 = arith.addf %71, %70 : vector<8x128xf32>
    %c832 = arith.constant 832 : index
    %c0_38 = arith.constant 0 : index
    %73 = vector.load %arg2[%c832, %c0_38] : memref<1184x128xf32, #tpu.memory_space<vmem>>, vector<8x17xf32>
    %cst_39 = arith.constant dense<0.000000e+00> : vector<8x64xf32>
    %74 = tpu.matmul %73, %65, %cst_39 {dimension_numbers = #tpu.dot_dimension_numbers<[1], [0], [0], [1], [0, 0, 1, 1], [], []>} : vector<8x17xf32>, vector<17x64xf32>, vector<8x64xf32> -> vector<8x64xf32>
    %c840 = arith.constant 840 : index
    %c0_40 = arith.constant 0 : index
    %75 = vector.load %arg2[%c840, %c0_40] : memref<1184x128xf32, #tpu.memory_space<vmem>>, vector<64x128xf32>
    %cst_41 = arith.constant dense<0.000000e+00> : vector<8x128xf32>
    %76 = tpu.matmul %74, %75, %cst_41 {dimension_numbers = #tpu.dot_dimension_numbers<[1], [0], [0], [1], [0, 0, 1, 1], [], []>} : vector<8x64xf32>, vector<64x128xf32>, vector<8x128xf32> -> vector<8x128xf32>
    %77 = arith.addf %72, %76 : vector<8x128xf32>
    %cst_42 = arith.constant 0.000000e+00 : f32
    %78 = vector.broadcast %cst_42 : f32 to vector<8x128xf32>
    %79 = arith.maximumf %77, %78 : vector<8x128xf32>
    %c912 = arith.constant 912 : index
    %c0_43 = arith.constant 0 : index
    %80 = vector.load %arg2[%c912, %c0_43] : memref<1184x128xf32, #tpu.memory_space<vmem>>, vector<128x128xf32>
    %cst_44 = arith.constant dense<0.000000e+00> : vector<8x128xf32>
    %81 = tpu.matmul %79, %80, %cst_44 {dimension_numbers = #tpu.dot_dimension_numbers<[1], [0], [0], [1], [0, 0, 1, 1], [], []>} : vector<8x128xf32>, vector<128x128xf32>, vector<8x128xf32> -> vector<8x128xf32>
    %c1040 = arith.constant 1040 : index
    %c0_45 = arith.constant 0 : index
    %82 = vector.load %arg2[%c1040, %c0_45] : memref<1184x128xf32, #tpu.memory_space<vmem>>, vector<1x128xf32>
    %83 = vector.broadcast %82 : vector<1x128xf32> to vector<8x128xf32>
    %84 = arith.addf %81, %83 : vector<8x128xf32>
    %cst_46 = arith.constant 0.000000e+00 : f32
    %85 = vector.broadcast %cst_46 : f32 to vector<8x128xf32>
    %86 = arith.maximumf %84, %85 : vector<8x128xf32>
    %c1048 = arith.constant 1048 : index
    %c0_47 = arith.constant 0 : index
    %87 = vector.load %arg2[%c1048, %c0_47] : memref<1184x128xf32, #tpu.memory_space<vmem>>, vector<128x128xf32>
    %cst_48 = arith.constant dense<0.000000e+00> : vector<8x128xf32>
    %88 = tpu.matmul %86, %87, %cst_48 {dimension_numbers = #tpu.dot_dimension_numbers<[1], [0], [0], [1], [0, 0, 1, 1], [], []>} : vector<8x128xf32>, vector<128x128xf32>, vector<8x128xf32> -> vector<8x128xf32>
    %c1176 = arith.constant 1176 : index
    %c0_49 = arith.constant 0 : index
    %89 = vector.load %arg2[%c1176, %c0_49] : memref<1184x128xf32, #tpu.memory_space<vmem>>, vector<1x128xf32>
    %90 = vector.broadcast %89 : vector<1x128xf32> to vector<8x128xf32>
    %91 = arith.addf %88, %90 : vector<8x128xf32>
    %c0_50 = arith.constant 0 : index
    %c0_51 = arith.constant 0 : index
    %92 = vector.load %arg3[%c0_50, %c0_51] : memref<8x128xf32, #tpu.memory_space<vmem>>, vector<8x128xf32>
    tpu.vector_store %arg3[%c0_50, %c0_51], %91 {strides = array<i32>} : memref<8x128xf32, #tpu.memory_space<vmem>>, vector<8x128xf32>,
    return
  }
  func.func @transform_0(%arg0: i32) -> (i32, i32) {
    %c0_i32 = arith.constant 0 : i32
    %c0_i32_0 = arith.constant 0 : i32
    %c0_i32_1 = arith.constant 0 : i32
    return %c0_i32, %c0_i32_0 : i32, i32
  }
  func.func @transform_1(%arg0: i32) -> (i32, i32) {
    %c0_i32 = arith.constant 0 : i32
    %c0_i32_0 = arith.constant 0 : i32
    %c0_i32_1 = arith.constant 0 : i32
    return %c0_i32, %c0_i32_0 : i32, i32
  }
  func.func @transform_2(%arg0: i32) -> (i32, i32) {
    %c0_i32 = arith.constant 0 : i32
    %c0_i32_0 = arith.constant 0 : i32
    %c0_i32_1 = arith.constant 0 : i32
    return %c0_i32, %c0_i32_0 : i32, i32
  }
}

</mosaic_0001>

<bundles_post_ra>
// kernel: _forward.1
= control target key start
LH: loop header
LB: loop body
LE: loop exit
PB: predicated region body
PF: predicated region fallthrough
CT: control target
= control target key end

     0   :  { %7 = vsyncpa [#allocation3], 0  ;;  %s2608_s9 = smov [#allocation2]   ;;  %s3041_s0 = inlined_call_operand.vmem [shape: f32[40,64], index: 0, kind: input, shape index: {}]   ;;  %s3042_s1 = inlined_call_operand.hbm [shape: f32[1184,128], index: 1, kind: input, shape index: {}]   ;;  %s3043_s2 = inlined_call_operand.vmem [shape: f32[8,128], index: 2, kind: output, shape index: {}]  }
   0x1   :  { %s15_s10 = sshll.u32 %s2608_s9, 4  ;;  %s16_s10 = int_to_ptr.vmem [resolvable:$true] %s15_s10 }
   0x2   :  { %s2594_s11 = scalar_lea.vmem %s16_s10, 18944  ;;  %p2599_p1 = scmp.lt.s32.totalorder %s16_s10, %s16_s10 }
   0x3   :  { %p2595_p0 = scmp.ne.s32.totalorder %s16_s10, %s2594_s11  ;;  %p2600_p2 = scmp.lt.s32.totalorder %s2594_s11, %s2594_s11 }
   0x5   :  { %p2601_p3 = por %p2600_p2, %p2599_p1 }
   0x7   :  { %p2602_p4 = pnand %p2601_p3, %p2595_p0 }
   0x9   :  { %2605 = shalt.err (!%p2602_p4)
}
   0xa   :  { %s2609_s12 = smov 128   ;;  %s2610_s13 = smov 8  }
   0xb   :  { %21 = dma.hbm_to_vmem [thread:$0]  %s3042_s1, 18944, %s16_s10, [#allocation3], %s2609_s12, %s2609_s12, %s2610_s13  }
   0xc   :  { %2606 = dma.done.wait [#allocation3], 18944  }
   0xd   :  { %2607 = vsyncadd [#allocation3], 4294948352  ;;  %v2611_v0 = vmov 0.0   ;;  %vm2612_vm0 = vmmov 0   ;;  %v50_v1 = vld [vmem:[#allocation2 + $0xc8] sm:$0xff]  ;;  %v37_v2 = vld [vmem:[#allocation2 + $0x38] sm:$0xff] }
   0xe   :  { %2134 = vmatprep.subr.mxu0 %v2611_v0  ;;  %2165 = vmatprep.subr.mxu1 %v2611_v0  ;;  %v49_v3 = vld [vmem:[#allocation2 + $0xc0] sm:$0xff]  ;;  %v36_v4 = vld [vmem:[#allocation2 + $0x30] sm:$0xff]  ;;  %v48_v5 = vld [vmem:[#allocation2 + $0xb8] sm:$0xff]  ;;  %vm51_vm1 = vcmask 523264   ;;  %vm651_vm2 = vcmask 1046528   ;;  %vm828_vm3 = vcmask 1045504  }
   0xf   :  { %2150 = vmatprep.mubr.msk.f32.mxu0 %vm2612_vm0, %v2611_v0  ;;  %2181 = vmatprep.mubr.msk.f32.mxu1 %vm2612_vm0, %v2611_v0  ;;  %v35_v6 = vld [vmem:[#allocation2 + $0x28] sm:$0xff]  ;;  %v47_v7 = vld [vmem:[#allocation2 + $0xb0] sm:$0xff]  ;;  %v34_v8 = vld [vmem:[#allocation2 + $0x20] sm:$0xff]  ;;  %vm709_vm4 = vcmask 1042432   ;;  %vm699_vm5 = vcmask 285696   ;;  %vm821_vm6 = vcmask 637952  }
  0x10   :  { %2135 = vmatpush3.msra.mxu0 %v50_v1  ;;  %2166 = vmatpush3.msra.mxu1 %v37_v2  ;;  %v46_v9 = vld [vmem:[#allocation2 + $0xa8] sm:$0xff]  ;;  %v33_v10 = vld [vmem:[#allocation2 + $0x18] sm:$0xff]  ;;  %v45_v11 = vld [vmem:[#allocation2 + $0xa0] sm:$0xff]  ;;  %vm1118_vm7 = vcmask 1044480   ;;  %vm1226_vm8 = vcmask 1043456   ;;  %s2614_s8 = smov 112  }
  0x11   :  { %2136 = vmatprep.subr.mxu0 %v2611_v0  ;;  %2167 = vmatprep.subr.mxu1 %v2611_v0  ;;  %v32_v12 = vld [vmem:[#allocation2 + $0x10] sm:$0xff]  ;;  %v44_v13 = vld [vmem:[#allocation2 + $0x98] sm:$0xff]  ;;  %v31_v14 = vld [vmem:[#allocation2 + $0x8] sm:$0xff]  ;;  %vm1370_vm9 = vcmask 1040384   ;;  %vm1366_vm10 = vcmask 138240  }
  0x12   :  { %2137 = vmatpush3.msra.mxu0 %v49_v3  ;;  %2168 = vmatpush3.msra.mxu1 %v36_v4  ;;  %v43_v15 = vld [vmem:[#allocation2 + $0x90] sm:$0xff]  ;;  %v30_v16 = vld [vmem:[#allocation2] sm:$0xff]  ;;  %v274_v19 = vld [vmem:[#allocation2 + $0x158] sm:$0xff] }
  0x13   :  { %2138 = vmatprep.subr.mxu0 %v2611_v0  ;;  %2169 = vmatprep.subr.mxu1 %v2611_v0  ;;  %v38_v17 = vld [vmem:[%s3041_s0 + $0x1] sm:$0xff]  ;;  %v39_v21 = vld [vmem:[%s3041_s0 + $0x9] sm:$0xff]  ;;  %v40_v24 = vld [vmem:[%s3041_s0 + $0x11] sm:$0xff] }
  0x14   :  { %2139 = vmatpush3.msra.mxu0 %v48_v5  ;;  %2170 = vmatpush3.msra.mxu1 %v35_v6  ;;  %v25_v18 = vld [vmem:[%s3041_s0] sm:$0xff]  ;;  %v397_v20 = vld [vmem:[#allocation2 + $0x1e8] sm:$0xff]  ;;  %v273_v23 = vld [vmem:[#allocation2 + $0x150] sm:$0xff] }
  0x15   :  { %2140 = vmatprep.subr.mxu0 %v2611_v0  ;;  %2171 = vmatprep.subr.mxu1 %v2611_v0  ;;  %v26_v22 = vld [vmem:[%s3041_s0 + $0x8] sm:$0xff]  ;;  %v27_v25 = vld [vmem:[%s3041_s0 + $0x10] sm:$0xff]  ;;  %v396_v27 = vld [vmem:[#allocation2 + $0x1e0] sm:$0xff] }
  0x16   :  { %2141 = vmatpush3.msra.mxu0 %v47_v7  ;;  %2172 = vmatpush3.msra.mxu1 %v34_v8  ;;  %v272_v26 = vld [vmem:[#allocation2 + $0x148] sm:$0xff]  ;;  %v271_v28 = vld [vmem:[#allocation2 + $0x140] sm:$0xff]  ;;  %v395_v29 = vld [vmem:[#allocation2 + $0x1d8] sm:$0xff] }
  0x17   :  { %2142 = vmatprep.subr.mxu0 %v2611_v0  ;;  %2173 = vmatprep.subr.mxu1 %v2611_v0  ;;  %v41_v30 = vld [vmem:[%s3041_s0 + $0x19] sm:$0xff]  ;;  %v394_v33 = vld [vmem:[#allocation2 + $0x1d0] sm:$0xff]  ;;  %v393_v35 = vld [vmem:[#allocation2 + $0x1c8] sm:$0xff] }
  0x18   :  { %2143 = vmatpush3.msra.mxu0 %v46_v9  ;;  %2174 = vmatpush3.msra.mxu1 %v33_v10  ;;  %v28_v31 = vld [vmem:[%s3041_s0 + $0x18] sm:$0xff]  ;;  %v269_v34 = vld [vmem:[#allocation2 + $0x130] sm:$0xff]  ;;  %v42_v36 = vld [vmem:[%s3041_s0 + $0x21] sm:$0xf] }
  0x19   :  { %2144 = vmatprep.subr.mxu0 %v2611_v0  ;;  %2175 = vmatprep.subr.mxu1 %v2611_v0  ;;  %v270_v32 = vld [vmem:[#allocation2 + $0x138] sm:$0xff]  ;;  %v29_v37 = vld [vmem:[%s3041_s0 + $0x20] sm:$0xf]  ;;  %v268_v38 = vld [vmem:[#allocation2 + $0x128] sm:$0xff] }
  0x1a   :  { %2145 = vmatpush3.msra.mxu0 %v45_v11  ;;  %2176 = vmatpush3.msra.mxu1 %v32_v12  ;;  %v392_v39 = vld [vmem:[#allocation2 + $0x1c0] sm:$0xff]  ;;  %v391_v41 = vld [vmem:[#allocation2 + $0x1b8] sm:$0xff]  ;;  %v390_v43 = vld [vmem:[#allocation2 + $0x1b0] sm:$0xff] }
  0x1b   :  { %2146 = vmatprep.subr.mxu0 %v2611_v0  ;;  %2177 = vmatprep.subr.mxu1 %v2611_v0  ;;  %v267_v40 = vld [vmem:[#allocation2 + $0x120] sm:$0xff]  ;;  %v263_v45 = vld [vmem:[%s3041_s0 + $0xa] sm:$0xff]  ;;  %v520_v46 = vld [vmem:[#allocation2 + $0x278] sm:$0xff] }
  0x1c   :  { %2147 = vmatpush3.msra.mxu0 %v44_v13  ;;  %2178 = vmatpush3.msra.mxu1 %v31_v14  ;;  %v262_v42 = vld [vmem:[%s3041_s0 + $0x2] sm:$0xff]  ;;  %v386_v47 = vld [vmem:[%s3041_s0 + $0xb] sm:$0xff]  ;;  %v387_v51 = vld [vmem:[%s3041_s0 + $0x13] sm:$0xff] }
  0x1d   :  { %2148 = vmatprep.subr.mxu0 %v2611_v0  ;;  %2179 = vmatprep.subr.mxu1 %v2611_v0  ;;  %v385_v44 = vld [vmem:[%s3041_s0 + $0x3] sm:$0xff]  ;;  %v519_v48 = vld [vmem:[#allocation2 + $0x270] sm:$0xff]  ;;  %v265_v53 = vld [vmem:[%s3041_s0 + $0x1a] sm:$0xff] }
  0x1e   :  { %2149 = vmatpush3.msra.mxu0 %v43_v15  ;;  %2180 = vmatpush3.msra.mxu1 %v30_v16  ;;  %v264_v49 = vld [vmem:[%s3041_s0 + $0x12] sm:$0xff]  ;;  %v518_v50 = vld [vmem:[#allocation2 + $0x268] sm:$0xff]  ;;  %v517_v52 = vld [vmem:[#allocation2 + $0x260] sm:$0xff] }
  0x1f   :  { %2151 = vmatmul.mubr.msk.f32.vlgmr.msra.gmra.mxu0 %vm51_vm1, %v38_v17  ;;  %2182 = vmatmul.mubr.msk.f32.vlgmr.msra.gmra.mxu1 %vm51_vm1, %v25_v18  ;;  %v516_v54 = vld [vmem:[#allocation2 + $0x258] sm:$0xff]  ;;  %v515_v56 = vld [vmem:[#allocation2 + $0x250] sm:$0xff]  ;;  %v266_v57 = vld [vmem:[%s3041_s0 + $0x22] sm:$0xf] }
  0x20   :  { %2153 = vmatprep.mubr.msk.f32.mxu0 %vm2612_vm0, %v2611_v0  ;;  %2184 = vmatprep.mubr.msk.f32.mxu1 %vm2612_vm0, %v2611_v0  ;;  %v388_v55 = vld [vmem:[%s3041_s0 + $0x1b] sm:$0xff]  ;;  %v514_v58 = vld [vmem:[#allocation2 + $0x248] sm:$0xff]  ;;  %v389_v59 = vld [vmem:[%s3041_s0 + $0x23] sm:$0xf] }
  0x21   :  { %2196 = vmatprep.subr.mxu0 %v2611_v0  ;;  %2227 = vmatprep.subr.mxu1 %v2611_v0  ;;  %v513_v60 = vld [vmem:[#allocation2 + $0x240] sm:$0xff]  ;;  %v509_v62 = vld [vmem:[%s3041_s0 + $0xc] sm:$0xff]  ;;  %v510_v63 = vld [vmem:[%s3041_s0 + $0x14] sm:$0xff] }
  0x22   :  { %2197 = vmatpush3.msra.mxu0 %v274_v19  ;;  %2228 = vmatpush3.msra.mxu1 %v397_v20  ;;  %v508_v61 = vld [vmem:[%s3041_s0 + $0x4] sm:$0xff]  ;;  %v511_v1 = vld [vmem:[%s3041_s0 + $0x1c] sm:$0xff] }
  0x23   :  { %2154 = vmatmul.mubr.msk.f32.gmra.mxu0 %vm51_vm1, %v39_v21  ;;  %2185 = vmatmul.mubr.msk.f32.gmra.mxu1 %vm51_vm1, %v26_v22  ;;  %v512_v2 = vld [vmem:[%s3041_s0 + $0x24] sm:$0xf]  ;;  %s2613_s0 = smov 122  }
  0x24   :  { %2198 = vmatprep.subr.mxu0 %v2611_v0  ;;  %2156 = vmatprep.mubr.msk.f32.mxu0 %vm2612_vm0, %v2611_v0 }
  0x25   :  { %2187 = vmatprep.mubr.msk.f32.mxu1 %vm2612_vm0, %v2611_v0  ;;  %2199 = vmatpush3.msra.mxu0 %v273_v23 }
  0x26   :  { %2200 = vmatprep.subr.mxu0 %v2611_v0  ;;  %2229 = vmatprep.subr.mxu1 %v2611_v0 }
  0x27   :  { %2157 = vmatmul.mubr.msk.f32.gmra.mxu0 %vm51_vm1, %v40_v24  ;;  %2188 = vmatmul.mubr.msk.f32.gmra.mxu1 %vm51_vm1, %v27_v25 }
  0x28   :  { %2201 = vmatpush3.msra.mxu0 %v272_v26  ;;  %2230 = vmatpush3.msra.mxu1 %v396_v27 }
  0x29   :  { %2202 = vmatprep.subr.mxu0 %v2611_v0  ;;  %2231 = vmatprep.subr.mxu1 %v2611_v0 }
  0x2a   :  { %2159 = vmatprep.mubr.msk.f32.mxu0 %vm2612_vm0, %v2611_v0  ;;  %2190 = vmatprep.mubr.msk.f32.mxu1 %vm2612_vm0, %v2611_v0 }
  0x2b   :  { %2203 = vmatpush3.msra.mxu0 %v271_v28  ;;  %2232 = vmatpush3.msra.mxu1 %v395_v29 }
  0x2c   :  { %2160 = vmatmul.mubr.msk.f32.gmra.mxu0 %vm51_vm1, %v41_v30  ;;  %2191 = vmatmul.mubr.msk.f32.gmra.mxu1 %vm51_vm1, %v28_v31 }
  0x2d   :  { %2204 = vmatprep.subr.mxu0 %v2611_v0  ;;  %2233 = vmatprep.subr.mxu1 %v2611_v0 }
  0x2e   :  { %2205 = vmatpush3.msra.mxu0 %v270_v32  ;;  %2234 = vmatpush3.msra.mxu1 %v394_v33 }
  0x2f   :  { %2206 = vmatprep.subr.mxu0 %v2611_v0  ;;  %2235 = vmatprep.subr.mxu1 %v2611_v0 }
  0x30   :  { %2162 = vmatprep.mubr.msk.f32.mxu0 %vm2612_vm0, %v2611_v0  ;;  %2193 = vmatprep.mubr.msk.f32.mxu1 %vm2612_vm0, %v2611_v0 }
  0x31   :  { %2207 = vmatpush3.msra.mxu0 %v269_v34  ;;  %2236 = vmatpush3.msra.mxu1 %v393_v35 }
  0x32   :  { %2163 = vmatmul.mubr.msk.f32.gmra.mxu0 %vm51_vm1, %v42_v36  ;;  %2194 = vmatmul.mubr.msk.f32.gmra.mxu1 %vm51_vm1, %v29_v37 }
  0x33   :  { %2208 = vmatprep.subr.mxu0 %v2611_v0  ;;  %2237 = vmatprep.subr.mxu1 %v2611_v0 }
  0x34   :  { %2209 = vmatpush3.msra.mxu0 %v268_v38  ;;  %2238 = vmatpush3.msra.mxu1 %v392_v39 }
  0x35   :  { %2210 = vmatprep.subr.mxu0 %v2611_v0  ;;  %2239 = vmatprep.subr.mxu1 %v2611_v0 }
  0x36   :  { %2211 = vmatpush3.msra.mxu0 %v267_v40  ;;  %2212 = vmatprep.mubr.msk.f32.mxu0 %vm2612_vm0, %v2611_v0 }
  0x37   :  { %2240 = vmatpush3.msra.mxu1 %v391_v41  ;;  %2213 = vmatmul.mubr.msk.f32.vlgmr.msra.gmra.mxu0 %vm51_vm1, %v262_v42 }
  0x38   :  { %2241 = vmatprep.subr.mxu1 %v2611_v0  ;;  %2243 = vmatprep.mubr.msk.f32.mxu1 %vm2612_vm0, %v2611_v0 }
  0x39   :  { %2242 = vmatpush3.msra.mxu1 %v390_v43  ;;  %2215 = vmatprep.mubr.msk.f32.mxu0 %vm2612_vm0, %v2611_v0 }
  0x3a   :  { %2244 = vmatmul.mubr.msk.f32.vlgmr.msra.gmra.mxu1 %vm51_vm1, %v385_v44  ;;  %2258 = vmatprep.subr.mxu0 %v2611_v0 }
  0x3b   :  { %2216 = vmatmul.mubr.msk.f32.gmra.mxu0 %vm51_vm1, %v263_v45  ;;  %2246 = vmatprep.mubr.msk.f32.mxu1 %vm2612_vm0, %v2611_v0 }
  0x3c   :  { %2259 = vmatpush3.msra.mxu0 %v520_v46  ;;  %2218 = vmatprep.mubr.msk.f32.mxu0 %vm2612_vm0, %v2611_v0 }
  0x3d   :  { %2260 = vmatprep.subr.mxu0 %v2611_v0  ;;  %2289 = vmatprep.subr.mxu1 %v2611_v0 }
  0x3e   :  { %2247 = vmatmul.mubr.msk.f32.gmra.mxu1 %vm51_vm1, %v386_v47  ;;  %2261 = vmatpush3.msra.mxu0 %v519_v48 }
  0x3f   :  { %2219 = vmatmul.mubr.msk.f32.gmra.mxu0 %vm51_vm1, %v264_v49  ;;  %2262 = vmatprep.subr.mxu0 %v2611_v0 }
  0x40   :  { %2249 = vmatprep.mubr.msk.f32.mxu1 %vm2612_vm0, %v2611_v0  ;;  %2263 = vmatpush3.msra.mxu0 %v518_v50 }
  0x41   :  { %2264 = vmatprep.subr.mxu0 %v2611_v0  ;;  %2221 = vmatprep.mubr.msk.f32.mxu0 %vm2612_vm0, %v2611_v0 }
  0x42   :  { %2250 = vmatmul.mubr.msk.f32.gmra.mxu1 %vm51_vm1, %v387_v51  ;;  %2265 = vmatpush3.msra.mxu0 %v517_v52 }
  0x43   :  { %2222 = vmatmul.mubr.msk.f32.gmra.mxu0 %vm51_vm1, %v265_v53  ;;  %2266 = vmatprep.subr.mxu0 %v2611_v0 }
  0x44   :  { %2252 = vmatprep.mubr.msk.f32.mxu1 %vm2612_vm0, %v2611_v0  ;;  %2267 = vmatpush3.msra.mxu0 %v516_v54 }
  0x45   :  { %2268 = vmatprep.subr.mxu0 %v2611_v0  ;;  %2224 = vmatprep.mubr.msk.f32.mxu0 %vm2612_vm0, %v2611_v0 }
  0x46   :  { %2253 = vmatmul.mubr.msk.f32.gmra.mxu1 %vm51_vm1, %v388_v55  ;;  %2269 = vmatpush3.msra.mxu0 %v515_v56 }
  0x47   :  { %2225 = vmatmul.mubr.msk.f32.gmra.mxu0 %vm51_vm1, %v266_v57  ;;  %2270 = vmatprep.subr.mxu0 %v2611_v0 }
  0x48   :  { %2255 = vmatprep.mubr.msk.f32.mxu1 %vm2612_vm0, %v2611_v0  ;;  %2271 = vmatpush3.msra.mxu0 %v514_v58 }
  0x49   :  { %2272 = vmatprep.subr.mxu0 %v2611_v0  ;;  %2274 = vmatprep.mubr.msk.f32.mxu0 %vm2612_vm0, %v2611_v0 }
  0x4a   :  { %2256 = vmatmul.mubr.msk.f32.gmra.mxu1 %vm51_vm1, %v389_v59  ;;  %2273 = vmatpush3.msra.mxu0 %v513_v60 }
  0x4b   :  { %2275 = vmatmul.mubr.msk.f32.vlgmr.msra.gmra.mxu0 %vm51_vm1, %v508_v61  ;;  %2299 = vmatprep.mubr.msk.f32.mxu1 %vm2612_vm0, %v2611_v0  ;;  %v1901_v61 = vld [vmem:[#allocation2 + $0x2d0] ss:$0 sm:$0xff] }
  0x4c   :  { %2277 = vmatprep.mubr.msk.f32.mxu0 %vm2612_vm0, %v2611_v0  ;;  %2308 = vmatprep.subr.mxu0 %v2611_v0 }
  0x4f   :  { %2278 = vmatmul.mubr.msk.f32.gmra.mxu0 %vm51_vm1, %v509_v62 }
  0x50   :  { %2280 = vmatprep.mubr.msk.f32.mxu0 %vm2612_vm0, %v2611_v0 }
  0x53   :  { %2281 = vmatmul.mubr.msk.f32.gmra.mxu0 %vm51_vm1, %v510_v63 }
  0x54   :  { %2283 = vmatprep.mubr.msk.f32.mxu0 %vm2612_vm0, %v2611_v0 }
  0x57   :  { %2284 = vmatmul.mubr.msk.f32.gmra.mxu0 %vm51_vm1, %v511_v1 }
  0x58   :  { %2286 = vmatprep.mubr.msk.f32.mxu0 %vm2612_vm0, %v2611_v0 }
  0x5b   :  { %2287 = vmatmul.mubr.msk.f32.gmra.mxu0 %vm51_vm1, %v512_v2 }
  0x5c   :  { %2328 = vmatprep.mubr.msk.f32.mxu0 %vm2612_vm0, %v2611_v0 }
  0xdf   :  { %v133_v3 = vpop.f32.mrf.mxu0  ;;  %v238_v4 = vpop.f32.mrf.mxu1 }
  0xe0   :  { %v239_v55 = vadd.f32 %v238_v4, %v133_v3 }
  0xe1   :  { %v2152_v5 = vpop.f32.mrf.mxu0  ;;  %v2183_v6 = vpop.f32.mrf.mxu1 }
  0xe3   :  { %v138_v7 = vpop.f32.mrf.mxu0  ;;  %v243_v8 = vpop.f32.mrf.mxu1 }
  0xe4   :  { %v244_v43 = vadd.f32 %v243_v8, %v138_v7 }
  0xe5   :  { %v2155_v9 = vpop.f32.mrf.mxu0  ;;  %v2186_v10 = vpop.f32.mrf.mxu1 }
  0xe7   :  { %v143_v11 = vpop.f32.mrf.mxu0  ;;  %v248_v12 = vpop.f32.mrf.mxu1 }
  0xe8   :  { %v249_v44 = vadd.f32 %v248_v12, %v143_v11 }
  0xe9   :  { %v2158_v13 = vpop.f32.mrf.mxu0  ;;  %v2189_v14 = vpop.f32.mrf.mxu1 }
  0xec   :  { %v148_v15 = vpop.f32.mrf.mxu0  ;;  %v253_v16 = vpop.f32.mrf.mxu1 }
  0xed   :  { %v254_v50 = vadd.f32 %v253_v16, %v148_v15 }
  0xee   :  { %v2161_v17 = vpop.f32.mrf.mxu0  ;;  %v2192_v18 = vpop.f32.mrf.mxu1 }
  0xf2   :  { %v153_v19 = vpop.f32.mrf.mxu0  ;;  %v258_v20 = vpop.f32.mrf.mxu1 }
  0xf3   :  { %v259_v57 = vadd.f32 %v258_v20, %v153_v19 }
  0xf4   :  { %v2164_v21 = vpop.f32.mrf.mxu0  ;;  %v2195_v22 = vpop.f32.mrf.mxu1 }
  0xf7   :  { %v356_v23 = vpop.f32.mrf.mxu0 }
  0xf8   :  { %v380_v60 = vadd.f32 %v356_v23, %v239_v55  ;;  %v800_v55 = vld [vmem:[#allocation2 + $0x78] sm:$0xff] }
  0xf9   :  { %v2214_v24 = vpop.f32.mrf.mxu0 }
  0xfa   :  { %v479_v25 = vpop.f32.mrf.mxu1 }
  0xfb   :  { %v361_v26 = vpop.f32.mrf.mxu0  ;;  %v503_v8 = vadd.f32 %v479_v25, %v380_v60  ;;  %v796_v60 = vld [vmem:[#allocation2 + $0x58] sm:$0xff] }
  0xfc   :  { %v2245_v27 = vpop.f32.mrf.mxu1  ;;  %v381_v47 = vadd.f32 %v361_v26, %v244_v43 }
  0xfd   :  { %v2217_v28 = vpop.f32.mrf.mxu0 }
  0xfe   :  { %v484_v29 = vpop.f32.mrf.mxu1 }
  0xff   :  { %v366_v30 = vpop.f32.mrf.mxu0  ;;  %v504_v52 = vadd.f32 %v484_v29, %v381_v47 }
 0x100   :  { %v2248_v31 = vpop.f32.mrf.mxu1  ;;  %v382_v48 = vadd.f32 %v366_v30, %v249_v44 }
 0x101   :  { %v2220_v32 = vpop.f32.mrf.mxu0 }
 0x102   :  { %v489_v33 = vpop.f32.mrf.mxu1 }
 0x103   :  { %v371_v34 = vpop.f32.mrf.mxu0  ;;  %v505_v53 = vadd.f32 %v489_v33, %v382_v48 }
 0x104   :  { %v2251_v35 = vpop.f32.mrf.mxu1  ;;  %v383_v54 = vadd.f32 %v371_v34, %v254_v50 }
 0x105   :  { %v2223_v36 = vpop.f32.mrf.mxu0  ;;  %v812_v35 = vld [vmem:[#allocation2 + $0x118] sm:$0x3f] }
 0x106   :  { %v494_v37 = vpop.f32.mrf.mxu1  ;;  %2309 = vmatpush3.msk.msra.mxu0 %vm828_vm3, %v812_v35  ;;  %v811_v36 = vld [vmem:[#allocation2 + $0x110] sm:$0xff] }
 0x107   :  { %v376_v38 = vpop.f32.mrf.mxu0  ;;  %v506_v63 = vadd.f32 %v494_v37, %v383_v54  ;;  %2310 = vmatprep.subr.mxu0 %v2611_v0  ;;  %v810_v37 = vld [vmem:[#allocation2 + $0x108] sm:$0xff] }
 0x108   :  { %v2254_v39 = vpop.f32.mrf.mxu1  ;;  %v384_v1 = vadd.f32 %v376_v38, %v259_v57  ;;  %2311 = vmatpush3.msra.mxu0 %v811_v36  ;;  %v809_v38 = vld [vmem:[#allocation2 + $0x100] sm:$0xff]  ;;  %v697_v54 = vld [vmem:[#allocation2 + $0x2e8] sm:$0xff]  ;;  %v698_v57 = vld [vmem:[#allocation2 + $0x2f0] sm:$0x3f] }
 0x109   :  { %v2226_v40 = vpop.f32.mrf.mxu0  ;;  %2312 = vmatprep.subr.mxu0 %v2611_v0  ;;  %v808_v39 = vld [vmem:[#allocation2 + $0xf8] sm:$0xff]  ;;  %v1003_v36 = vld [vmem:[#allocation2 + $0x170] sm:$0xff] }
 0x10a   :  { %v499_v41 = vpop.f32.mrf.mxu1  ;;  %2313 = vmatpush3.msra.mxu0 %v810_v37  ;;  %v807_v40 = vld [vmem:[#allocation2 + $0xf0] sm:$0xff] }
 0x10b   :  { %v602_v42 = vpop.f32.mrf.mxu0  ;;  %v507_v10 = vadd.f32 %v499_v41, %v384_v1  ;;  %2314 = vmatprep.subr.mxu0 %v2611_v0  ;;  %v806_v1 = vld [vmem:[#allocation2 + $0xe8] sm:$0xff] }
 0x10c   :  { %v2257_v45 = vpop.f32.mrf.mxu1  ;;  %v626_v13 = vadd.f32 %v602_v42, %v503_v8  ;;  %2315 = vmatpush3.msra.mxu0 %v809_v38  ;;  %v1002_v38 = vld [vmem:[#allocation2 + $0x168] sm:$0xff] }
 0x10d   :  { %v2276_v46 = vpop.f32.mrf.mxu0  ;;  %2316 = vmatprep.subr.mxu0 %v2611_v0 }
 0x10e   :  { %v636_v20 = vadd.f32 %v1901_v61, %v626_v13  ;;  %2317 = vmatpush3.msra.mxu0 %v808_v39 }
 0x10f   :  { %v607_v49 = vpop.f32.mrf.mxu0  ;;  %2318 = vmatprep.subr.mxu0 %v2611_v0 }
 0x110   :  { %v627_v58 = vadd.f32 %v607_v49, %v504_v52  ;;  %v641_v27 = vmax.f32 %v636_v20, 0.0  ;;  %2319 = vmatpush3.msra.mxu0 %v807_v40  ;;  %v802_v52 = vld [vmem:[#allocation2 + $0x88] sm:$0x3f] }
 0x111   :  { %v2279_v51 = vpop.f32.mrf.mxu0  ;;  %2320 = vmatprep.subr.mxu0 %v2611_v0 }
 0x112   :  { %v637_v6 = vadd.f32 %v1901_v61, %v627_v58  ;;  %v652_v31 = vrot.slane %v641_v27, 1  ;;  %v696_v51 = vld [vmem:[#allocation2 + $0x2e0] sm:$0xff]  ;;  %v798_v58 = vld [vmem:[#allocation2 + $0x68] sm:$0xff]  ;;  %2321 = vmatpush3.msra.mxu0 %v806_v1 }
 0x113   :  { %v612_v56 = vpop.f32.mrf.mxu0  ;;  %2322 = vmatprep.subr.mxu0 %v2611_v0 }
 0x114   :  { %v628_v59 = vadd.f32 %v612_v56, %v505_v53  ;;  %v642_v4 = vmax.f32 %v637_v6, 0.0  ;;  %v801_v53 = vld [vmem:[#allocation2 + $0x80] sm:$0xff]  ;;  %v799_v56 = vld [vmem:[#allocation2 + $0x70] sm:$0xff] }
 0x115   :  { %v2282_v62 = vpop.f32.mrf.mxu0  ;;  %v803_v6 = vld [vmem:[#allocation2 + $0xd0] sm:$0xff] }
 0x116   :  { %v638_v2 = vadd.f32 %v1901_v61, %v628_v59  ;;  %v653_v21 = vrot.slane %v642_v4, 1  ;;  %v797_v59 = vld [vmem:[#allocation2 + $0x60] sm:$0xff]  ;;  %v794_v62 = vld [vmem:[#allocation2 + $0x48] sm:$0xff] }
 0x117   :  { %v617_v5 = vpop.f32.mrf.mxu0 }
 0x118   :  { %v629_v7 = vadd.f32 %v617_v5, %v506_v63  ;;  %v643_v11 = vmax.f32 %v638_v2, 0.0  ;;  %v654_v33 = vsel %vm651_vm2, %v652_v31, %v653_v21  ;;  %v793_v63 = vld [vmem:[#allocation2 + $0x40] sm:$0xff]  ;;  %v804_v5 = vld [vmem:[#allocation2 + $0xd8] sm:$0xff] }
 0x119   :  { %v2285_v9 = vpop.f32.mrf.mxu0  ;;  %v666_v34 = vmax.f32 %v641_v27, %v654_v33  ;;  %v805_v2 = vld [vmem:[#allocation2 + $0xe0] sm:$0xff] }
 0x11a   :  { %v639_v12 = vadd.f32 %v1901_v61, %v629_v7  ;;  %v655_v17 = vrot.slane %v643_v11, 1  ;;  %2323 = vmatpush3.msra.mxu0 %v805_v2  ;;  %v1117_v7 = vld [vmem:[#allocation2 + $0x238] sm:$0x3f]  ;;  %v1116_v9 = vld [vmem:[#allocation2 + $0x230] sm:$0xff]  ;;  %v1110_v27 = vld [vmem:[#allocation2 + $0x200] sm:$0xff] }
 0x11b   :  { %v622_v3 = vpop.f32.mrf.mxu0  ;;  %2324 = vmatprep.subr.mxu0 %v2611_v0 }
 0x11c   :  { %v644_v14 = vmax.f32 %v639_v12, 0.0  ;;  %v630_v15 = vadd.f32 %v622_v3, %v507_v10  ;;  %v656_v26 = vsel %vm651_vm2, %v653_v21, %v655_v17  ;;  %2325 = vmatpush3.msra.mxu0 %v804_v5  ;;  %v1112_v21 = vld [vmem:[#allocation2 + $0x210] sm:$0xff] }
 0x11d   :  { %v2288_v16 = vpop.f32.mrf.mxu0  ;;  %v667_v29 = vmax.f32 %v642_v4, %v656_v26  ;;  %2326 = vmatprep.subr.mxu0 %v2611_v0  ;;  %v1114_v4 = vld [vmem:[#allocation2 + $0x220] sm:$0xff]  ;;  %v1007_v26 = vld [vmem:[#allocation2 + $0x190] sm:$0xff] }
 0x11e   :  { %v657_v18 = vrot.slane %v644_v14, 1  ;;  %v640_v19 = vadd.f32 %v1901_v61, %v630_v15  ;;  %v795_v61 = vld [vmem:[#allocation2 + $0x50] sm:$0xff]  ;;  %2327 = vmatpush3.msra.mxu0 %v803_v6  ;;  %v1010_v15 = vld [vmem:[#allocation2 + $0x1a8] sm:$0x3f] }
 0x11f   :  { %2366 = vmatprep.subr.mxu0 %v2611_v0 }
 0x120   :  { %v645_v22 = vmax.f32 %v640_v19, 0.0  ;;  %v658_v23 = vsel %vm651_vm2, %v655_v17, %v657_v18  ;;  %v1113_v17 = vld [vmem:[#allocation2 + $0x218] sm:$0xff]  ;;  %v1009_v19 = vld [vmem:[#allocation2 + $0x1a0] sm:$0xff] }
 0x121   :  { %v668_v24 = vmax.f32 %v643_v11, %v658_v23  ;;  %v1115_v11 = vld [vmem:[#allocation2 + $0x228] sm:$0xff] }
 0x122   :  { %v659_v25 = vrot.slane %v645_v22, 1 }
 0x123   :  { %680 = vrot.lane.b32.xlu1 %v668_v24, %s2613_s0 }
 0x124   :  { %v670_v28 = vmax.f32 %v645_v22, %v659_v25  ;;  %v660_v30 = vsel %vm651_vm2, %v657_v18, %v659_v25  ;;  %v1111_v25 = vld [vmem:[#allocation2 + $0x208] sm:$0xff] }
 0x125   :  { %v669_v32 = vmax.f32 %v644_v14, %v660_v30  ;;  %v1005_v30 = vld [vmem:[#allocation2 + $0x180] sm:$0xff] }
 0x126   :  { %684 = vrot.lane.b32.xlu0 %v670_v28, %s2613_s0 }
 0x127   :  { %678 = vrot.lane.b32.xlu1 %v667_v29, %s2613_s0 }
 0x12a   :  { %682 = vrot.lane.b32.xlu0 %v669_v32, %s2613_s0 }
 0x12e   :  { %676 = vrot.lane.b32.xlu0 %v666_v34, %s2613_s0 }
 0x195   :  { %v681_v41 = vpop.permute.xlu1 %680 }
 0x196   :  { %v693_v47 = vmax.f32 %v668_v24, %v681_v41  ;;  %v1008_v24 = vld [vmem:[#allocation2 + $0x198] sm:$0xff]  ;;  %v1001_v41 = vld [vmem:[#allocation2 + $0x160] sm:$0xff] }
 0x198   :  { %v685_v42 = vpop.permute.xlu0 %684 }
 0x199   :  { %v695_v43 = vmax.f32 %v670_v28, %v685_v42  ;;  %v679_v46 = vpop.permute.xlu1 %678  ;;  %v1006_v28 = vld [vmem:[#allocation2 + $0x188] sm:$0xff] }
 0x19a   :  { %v692_v49 = vmax.f32 %v667_v29, %v679_v46  ;;  %v1109_v29 = vld [vmem:[#allocation2 + $0x1f8] sm:$0xff]  ;;  %v1224_v46 = vld [vmem:[#allocation2 + $0x2c0] sm:$0xff] }
 0x19b   :  { %2290 = vmatpush3.msk.msra.mxu1 %vm709_vm4, %v695_v43  ;;  %v1225_v43 = vld [vmem:[#allocation2 + $0x2c8] sm:$0x3f] }
 0x19c   :  { %v683_v44 = vpop.permute.xlu0 %682  ;;  %2291 = vmatprep.subr.mxu1 %v2611_v0 }
 0x19d   :  { %v694_v45 = vmax.f32 %v669_v32, %v683_v44  ;;  %v1108_v32 = vld [vmem:[#allocation2 + $0x1f0] sm:$0xff] }
 0x19f   :  { %2292 = vmatpush3.msra.mxu1 %v694_v45 }
 0x1a0   :  { %2293 = vmatprep.subr.mxu1 %v2611_v0  ;;  %v677_v48 = vpop.permute.xlu0 %676 }
 0x1a1   :  { %2294 = vmatpush3.msra.mxu1 %v693_v47  ;;  %v691_v50 = vmax.f32 %v666_v34, %v677_v48  ;;  %v1004_v34 = vld [vmem:[#allocation2 + $0x178] sm:$0xff] }
 0x1a2   :  { %2295 = vmatprep.subr.mxu1 %v2611_v0  ;;  %v1223_v47 = vld [vmem:[#allocation2 + $0x2b8] sm:$0xff] }
 0x1a3   :  { %2296 = vmatpush3.msra.mxu1 %v692_v49  ;;  %v1222_v49 = vld [vmem:[#allocation2 + $0x2b0] sm:$0xff] }
 0x1a4   :  { %2297 = vmatprep.subr.mxu1 %v2611_v0 }
 0x1a5   :  { %2298 = vmatpush3.msra.mxu1 %v691_v50  ;;  %v1221_v50 = vld [vmem:[#allocation2 + $0x2a8] sm:$0xff] }
 0x1a6   :  { %2300 = vmatmul.mubr.msk.f32.vlgmr.msra.gmra.mxu1 %vm699_vm5, %v696_v51  ;;  %2337 = vmatprep.subr.mxu1 %v2611_v0  ;;  %v1220_v51 = vld [vmem:[#allocation2 + $0x2a0] sm:$0xff] }
 0x1a7   :  { %2302 = vmatprep.mubr.msk.f32.mxu1 %vm2612_vm0, %v2611_v0  ;;  %2338 = vmatpush3.msk.msra.mxu1 %vm828_vm3, %v802_v52  ;;  %v1219_v52 = vld [vmem:[#allocation2 + $0x298] sm:$0xff] }
 0x1a8   :  { %2339 = vmatprep.subr.mxu1 %v2611_v0 }
 0x1a9   :  { %2340 = vmatpush3.msra.mxu1 %v801_v53  ;;  %v1218_v53 = vld [vmem:[#allocation2 + $0x290] sm:$0xff] }
 0x1aa   :  { %2303 = vmatmul.mubr.msk.f32.gmra.mxu1 %vm699_vm5, %v697_v54  ;;  %2341 = vmatprep.subr.mxu1 %v2611_v0  ;;  %v1217_v54 = vld [vmem:[#allocation2 + $0x288] sm:$0xff] }
 0x1ab   :  { %2305 = vmatprep.mubr.msk.f32.mxu1 %vm2612_vm0, %v2611_v0  ;;  %2342 = vmatpush3.msra.mxu1 %v800_v55 }
 0x1ac   :  { %2343 = vmatprep.subr.mxu1 %v2611_v0 }
 0x1ad   :  { %2344 = vmatpush3.msra.mxu1 %v799_v56  ;;  %v1216_v56 = vld [vmem:[#allocation2 + $0x280] sm:$0xff] }
 0x1ae   :  { %2306 = vmatmul.mubr.msk.f32.gmra.mxu1 %vm699_vm5, %v698_v57  ;;  %2345 = vmatprep.subr.mxu1 %v2611_v0 }
 0x1af   :  { %2346 = vmatpush3.msra.mxu1 %v798_v58  ;;  %2357 = vmatprep.mubr.msk.f32.mxu1 %vm2612_vm0, %v2611_v0 }
 0x1b0   :  { %2347 = vmatprep.subr.mxu1 %v2611_v0 }
 0x1b1   :  { %2348 = vmatpush3.msra.mxu1 %v797_v59 }
 0x1b2   :  { %2349 = vmatprep.subr.mxu1 %v2611_v0 }
 0x1b3   :  { %2350 = vmatpush3.msra.mxu1 %v796_v60 }
 0x1b4   :  { %2351 = vmatprep.subr.mxu1 %v2611_v0 }
 0x1b5   :  { %2352 = vmatpush3.msra.mxu1 %v795_v61 }
 0x1b6   :  { %2353 = vmatprep.subr.mxu1 %v2611_v0 }
 0x1b7   :  { %2354 = vmatpush3.msra.mxu1 %v794_v62 }
 0x1b8   :  { %2355 = vmatprep.subr.mxu1 %v2611_v0 }
 0x1b9   :  { %2356 = vmatpush3.msra.mxu1 %v793_v63 }
 0x1ba   :  { %2395 = vmatprep.subr.mxu1 %v2611_v0 }
 0x266   :  { %v2869_v8 = vpop.f32.mrf.mxu1 }
 0x267   :  { %2358 = vmatmul.mubr.msk.f32.vlgmr.msra.gmra.mxu1 %vm821_vm6, %v2869_v8  ;;  %v816_v13 = vrot.slane %v2869_v8, 1  ;;  %v1119_v33 = vrot.slane %v2869_v8, 3  ;;  %v1011_v42 = vrot.slane %v2869_v8, 2  ;;  %v1227_v57 = vrot.slane %v2869_v8, 4 }
 0x268   :  { %2396 = vmatpush3.msk.msra.mxu1 %vm828_vm3, %v1117_v7  ;;  %v2301_v10 = vpop.f32.mrf.mxu1  ;;  %2360 = vmatprep.mubr.msk.f32.mxu1 %vm2612_vm0, %v2611_v0 }
 0x269   :  { %2397 = vmatprep.subr.mxu1 %v2611_v0 }
 0x26a   :  { %2398 = vmatpush3.msra.mxu1 %v1116_v9  ;;  %v2877_v12 = vpop.f32.mrf.mxu1 }
 0x26b   :  { %v817_v3 = vrot.slane %v2877_v12, 1  ;;  %2399 = vmatprep.subr.mxu1 %v2611_v0  ;;  %2361 = vmatmul.mubr.msk.f32.gmra.mxu1 %vm821_vm6, %v2877_v12  ;;  %v1120_v31 = vrot.slane %v2877_v12, 3  ;;  %v1012_v39 = vrot.slane %v2877_v12, 2  ;;  %v1228_v55 = vrot.slane %v2877_v12, 4 }
 0x26c   :  { %2400 = vmatpush3.msra.mxu1 %v1115_v11  ;;  %v2304_v14 = vpop.f32.mrf.mxu1  ;;  %2363 = vmatprep.mubr.msk.f32.mxu1 %vm2612_vm0, %v2611_v0 }
 0x26d   :  { %2401 = vmatprep.subr.mxu1 %v2611_v0  ;;  %v818_v16 = vsel %vm651_vm2, %v816_v13, %v817_v3  ;;  %v1121_v35 = vsel %vm1118_vm7, %v1119_v33, %v1120_v31  ;;  %v1013_v44 = vsel %vm828_vm3, %v1011_v42, %v1012_v39  ;;  %v1229_v58 = vsel %vm1226_vm8, %v1227_v57, %v1228_v55  ;;  %v1449_v57 = vld [vmem:[#allocation2 + $0x328] sm:$0xff] }
 0x26e   :  { %2402 = vmatpush3.msra.mxu1 %v1114_v4  ;;  %v2888_v18 = vpop.f32.mrf.mxu1  ;;  %2329 = vmatmul.mubr.msk.f32.vlgmr.msra.gmra.mxu0 %vm821_vm6, %v818_v16 }
 0x26f   :  { %2367 = vmatpush3.msk.msra.mxu0 %vm828_vm3, %v1010_v15  ;;  %2403 = vmatprep.subr.mxu1 %v2611_v0  ;;  %v819_v20 = vrot.slane %v2888_v18, 1  ;;  %v1122_v37 = vrot.slane %v2888_v18, 3  ;;  %v1014_v45 = vrot.slane %v2888_v18, 2  ;;  %v1230_v59 = vrot.slane %v2888_v18, 4 }
 0x270   :  { %2368 = vmatprep.subr.mxu0 %v2611_v0  ;;  %2404 = vmatpush3.msra.mxu1 %v1113_v17  ;;  %v2307_v22 = vpop.f32.mrf.mxu1 }
 0x271   :  { %2369 = vmatpush3.msra.mxu0 %v1009_v19  ;;  %2405 = vmatprep.subr.mxu1 %v2611_v0  ;;  %v820_v23 = vsel %vm651_vm2, %v817_v3, %v819_v20  ;;  %v1123_v40 = vsel %vm1118_vm7, %v1120_v31, %v1122_v37  ;;  %v1015_v48 = vsel %vm828_vm3, %v1012_v39, %v1014_v45 }
 0x272   :  { %2331 = vmatprep.mubr.msk.f32.mxu0 %vm2612_vm0, %v2611_v0  ;;  %2370 = vmatprep.subr.mxu0 %v2611_v0  ;;  %v1231_v60 = vsel %vm1226_vm8, %v1228_v55, %v1230_v59  ;;  %v1450_v55 = vld [vmem:[#allocation2 + $0x330] sm:$0xff] }
 0x273   :  { %2406 = vmatpush3.msra.mxu1 %v1112_v21  ;;  %2332 = vmatmul.mubr.msk.f32.gmra.mxu0 %vm821_vm6, %v820_v23 }
 0x274   :  { %2371 = vmatpush3.msra.mxu0 %v1008_v24  ;;  %2407 = vmatprep.subr.mxu1 %v2611_v0 }
 0x275   :  { %2372 = vmatprep.subr.mxu0 %v2611_v0  ;;  %2408 = vmatpush3.msra.mxu1 %v1111_v25 }
 0x276   :  { %2373 = vmatpush3.msra.mxu0 %v1007_v26  ;;  %2409 = vmatprep.subr.mxu1 %v2611_v0 }
 0x277   :  { %2374 = vmatprep.subr.mxu0 %v2611_v0  ;;  %2410 = vmatpush3.msra.mxu1 %v1110_v27 }
 0x278   :  { %2364 = vmatmul.mubr.msk.f32.gmra.mxu1 %vm821_vm6, %v2888_v18  ;;  %2375 = vmatpush3.msra.mxu0 %v1006_v28 }
 0x279   :  { %2411 = vmatprep.subr.mxu1 %v2611_v0  ;;  %2376 = vmatprep.subr.mxu0 %v2611_v0 }
 0x27a   :  { %2412 = vmatpush3.msra.mxu1 %v1109_v29  ;;  %2334 = vmatprep.mubr.msk.f32.mxu0 %vm2612_vm0, %v2611_v0 }
 0x27b   :  { %2377 = vmatpush3.msra.mxu0 %v1005_v30  ;;  %2413 = vmatprep.subr.mxu1 %v2611_v0 }
 0x27c   :  { %2335 = vmatmul.mubr.msk.f32.gmra.mxu0 %vm821_vm6, %v819_v20  ;;  %2378 = vmatprep.subr.mxu0 %v2611_v0 }
 0x27d   :  { %2414 = vmatpush3.msra.mxu1 %v1108_v32  ;;  %2415 = vmatprep.mubr.msk.f32.mxu1 %vm2612_vm0, %v2611_v0 }
 0x27e   :  { %2379 = vmatpush3.msra.mxu0 %v1004_v34  ;;  %2416 = vmatmul.mubr.msk.f32.vlgmr.msra.gmra.mxu1 %vm821_vm6, %v1121_v35  ;;  %v1926_v34 = vld [vmem:[#allocation2 + $0x2d8] ss:$0 sm:$0xff] }
 0x27f   :  { %2380 = vmatprep.subr.mxu0 %v2611_v0  ;;  %2418 = vmatprep.mubr.msk.f32.mxu1 %vm2612_vm0, %v2611_v0 }
 0x280   :  { %2381 = vmatpush3.msra.mxu0 %v1003_v36  ;;  %2386 = vmatprep.mubr.msk.f32.mxu0 %vm2612_vm0, %v2611_v0 }
 0x281   :  { %2382 = vmatprep.subr.mxu0 %v2611_v0  ;;  %2462 = vmatprep.subr.mxu1 %v2611_v0 }
 0x282   :  { %2383 = vmatpush3.msra.mxu0 %v1002_v38  ;;  %2419 = vmatmul.mubr.msk.f32.gmra.mxu1 %vm821_vm6, %v1123_v40 }
 0x283   :  { %2384 = vmatprep.subr.mxu0 %v2611_v0  ;;  %2421 = vmatprep.mubr.msk.f32.mxu1 %vm2612_vm0, %v2611_v0 }
 0x284   :  { %2385 = vmatpush3.msra.mxu0 %v1001_v41 }
 0x285   :  { %2387 = vmatmul.mubr.msk.f32.vlgmr.msra.gmra.mxu0 %vm821_vm6, %v1013_v44  ;;  %2424 = vmatprep.subr.mxu0 %v2611_v0 }
 0x286   :  { %2422 = vmatmul.mubr.msk.f32.gmra.mxu1 %vm821_vm6, %v1122_v37  ;;  %2425 = vmatpush3.msk.msra.mxu0 %vm828_vm3, %v1225_v43 }
 0x287   :  { %2426 = vmatprep.subr.mxu0 %v2611_v0  ;;  %2389 = vmatprep.mubr.msk.f32.mxu0 %vm2612_vm0, %v2611_v0 }
 0x288   :  { %2427 = vmatpush3.msra.mxu0 %v1224_v46  ;;  %2478 = vmatprep.mubr.msk.f32.mxu1 %vm2612_vm0, %v2611_v0 }
 0x289   :  { %2390 = vmatmul.mubr.msk.f32.gmra.mxu0 %vm821_vm6, %v1015_v48  ;;  %2428 = vmatprep.subr.mxu0 %v2611_v0 }
 0x28a   :  { %2429 = vmatpush3.msra.mxu0 %v1223_v47  ;;  %2392 = vmatprep.mubr.msk.f32.mxu0 %vm2612_vm0, %v2611_v0 }
 0x28b   :  { %2430 = vmatprep.subr.mxu0 %v2611_v0 }
 0x28c   :  { %2431 = vmatpush3.msra.mxu0 %v1222_v49 }
 0x28d   :  { %2393 = vmatmul.mubr.msk.f32.gmra.mxu0 %vm821_vm6, %v1014_v45  ;;  %2432 = vmatprep.subr.mxu0 %v2611_v0 }
 0x28e   :  { %2433 = vmatpush3.msra.mxu0 %v1221_v50  ;;  %2444 = vmatprep.mubr.msk.f32.mxu0 %vm2612_vm0, %v2611_v0 }
 0x28f   :  { %2434 = vmatprep.subr.mxu0 %v2611_v0 }
 0x290   :  { %2435 = vmatpush3.msra.mxu0 %v1220_v51 }
 0x291   :  { %2436 = vmatprep.subr.mxu0 %v2611_v0 }
 0x292   :  { %2437 = vmatpush3.msra.mxu0 %v1219_v52 }
 0x293   :  { %2438 = vmatprep.subr.mxu0 %v2611_v0 }
 0x294   :  { %2439 = vmatpush3.msra.mxu0 %v1218_v53 }
 0x295   :  { %2440 = vmatprep.subr.mxu0 %v2611_v0 }
 0x296   :  { %2441 = vmatpush3.msra.mxu0 %v1217_v54  ;;  %v1451_v54 = vld [vmem:[#allocation2 + $0x338] sm:$0xff] }
 0x297   :  { %2442 = vmatprep.subr.mxu0 %v2611_v0  ;;  %2463 = vmatpush3.msra.mxu1 %v1451_v54 }
 0x298   :  { %2443 = vmatpush3.msra.mxu0 %v1216_v56  ;;  %2464 = vmatprep.subr.mxu1 %v2611_v0 }
 0x299   :  { %2445 = vmatmul.mubr.msk.f32.vlgmr.msra.gmra.mxu0 %vm821_vm6, %v1229_v58  ;;  %2453 = vmatprep.subr.mxu0 %v2611_v0  ;;  %v1448_v58 = vld [vmem:[#allocation2 + $0x320] sm:$0xff] }
 0x29a   :  { %2447 = vmatprep.mubr.msk.f32.mxu0 %vm2612_vm0, %v2611_v0  ;;  %2465 = vmatpush3.msra.mxu1 %v1450_v55 }
 0x29b   :  { %2466 = vmatprep.subr.mxu1 %v2611_v0 }
 0x29c   :  { %2467 = vmatpush3.msra.mxu1 %v1449_v57  ;;  %v1781_v57 = vld [vmem:[#allocation2 + $0x428] sm:$0xff] }
 0x29d   :  { %2448 = vmatmul.mubr.msk.f32.gmra.mxu0 %vm821_vm6, %v1231_v60  ;;  %2468 = vmatprep.subr.mxu1 %v2611_v0  ;;  %v1446_v60 = vld [vmem:[#allocation2 + $0x310] sm:$0xff] }
 0x29e   :  { %2450 = vmatprep.mubr.msk.f32.mxu0 %vm2612_vm0, %v2611_v0  ;;  %2469 = vmatpush3.msra.mxu1 %v1448_v58  ;;  %v1780_v58 = vld [vmem:[#allocation2 + $0x420] sm:$0xff] }
 0x29f   :  { %2470 = vmatprep.subr.mxu1 %v2611_v0 }
 0x2a1   :  { %2451 = vmatmul.mubr.msk.f32.gmra.mxu0 %vm821_vm6, %v1230_v59  ;;  %v1447_v59 = vld [vmem:[#allocation2 + $0x318] sm:$0xff] }
 0x2a2   :  { %2459 = vmatprep.mubr.msk.f32.mxu0 %vm2612_vm0, %v2611_v0  ;;  %2471 = vmatpush3.msra.mxu1 %v1447_v59  ;;  %v1779_v59 = vld [vmem:[#allocation2 + $0x418] sm:$0xff] }
 0x2a3   :  { %2472 = vmatprep.subr.mxu1 %v2611_v0 }
 0x2a4   :  { %2473 = vmatpush3.msra.mxu1 %v1446_v60  ;;  %v1934_v60 = vld [vmem:[#allocation2 + $0x410] ss:$0 sm:$0xff] }
 0x2a5   :  { %2474 = vmatprep.subr.mxu1 %v2611_v0 }
 0x327   :  { %v987_v61 = vpop.f32.mrf.mxu1 }
 0x329   :  { %v2359_v62 = vpop.f32.mrf.mxu1 }
 0x32a   :  { %v1444_v62 = vld [vmem:[#allocation2 + $0x300] sm:$0xff] }
 0x32b   :  { %v992_v63 = vpop.f32.mrf.mxu1 }
 0x32d   :  { %v2362_v1 = vpop.f32.mrf.mxu1 }
 0x32e   :  { %v898_v2 = vpop.f32.mrf.mxu0 }
 0x32f   :  { %v988_v22 = vadd.f32 %v987_v61, %v898_v2  ;;  %v1445_v61 = vld [vmem:[#allocation2 + $0x308] sm:$0xff] }
 0x330   :  { %v2330_v5 = vpop.f32.mrf.mxu0  ;;  %2475 = vmatpush3.msra.mxu1 %v1445_v61 }
 0x331   :  { %2476 = vmatprep.subr.mxu1 %v2611_v0 }
 0x332   :  { %2477 = vmatpush3.msra.mxu1 %v1444_v62 }
 0x333   :  { %v903_v6 = vpop.f32.mrf.mxu0  ;;  %2490 = vmatprep.subr.mxu1 %v2611_v0 }
 0x334   :  { %v993_v23 = vadd.f32 %v992_v63, %v903_v6 }
 0x335   :  { %v2333_v7 = vpop.f32.mrf.mxu0 }
 0x338   :  { %v997_v8 = vpop.f32.mrf.mxu1 }
 0x33a   :  { %v2365_v9 = vpop.f32.mrf.mxu1 }
 0x33b   :  { %v1530_v9 = vld [vmem:[#allocation2 + $0x340] sm:$0xff] }
 0x33c   :  { %v908_v10 = vpop.f32.mrf.mxu0 }
 0x33d   :  { %v998_v27 = vadd.f32 %v997_v8, %v908_v10  ;;  %v1365_v8 = vld [vmem:[#allocation2 + $0x2f8] sm:$0xff]  ;;  %v1702_v10 = vld [vmem:[#allocation2 + $0x408] sm:$0xff] }
 0x33e   :  { %v1199_v11 = vpop.f32.mrf.mxu1  ;;  %v2336_v12 = vpop.f32.mrf.mxu0 }
 0x33f   :  { %v1700_v12 = vld [vmem:[#allocation2 + $0x3f8] sm:$0xff] }
 0x340   :  { %v2417_v13 = vpop.f32.mrf.mxu1 }
 0x341   :  { %v1699_v13 = vld [vmem:[#allocation2 + $0x3f0] sm:$0xff] }
 0x342   :  { %v1204_v3 = vpop.f32.mrf.mxu1 }
 0x344   :  { %v2420_v4 = vpop.f32.mrf.mxu1 }
 0x345   :  { %v1091_v14 = vpop.f32.mrf.mxu0  ;;  %v1697_v4 = vld [vmem:[#allocation2 + $0x3e0] sm:$0xff] }
 0x346   :  { %v1209_v15 = vpop.f32.mrf.mxu1  ;;  %v1105_v24 = vadd.f32 %v1091_v14, %v988_v22  ;;  %v1696_v14 = vld [vmem:[#allocation2 + $0x3d8] sm:$0xff]  ;;  %v1608_v22 = vld [vmem:[#allocation2 + $0x368] sm:$0xff] }
 0x347   :  { %v2388_v16 = vpop.f32.mrf.mxu0 }
 0x348   :  { %v2423_v17 = vpop.f32.mrf.mxu1  ;;  %v1213_v28 = vadd.f32 %v1199_v11, %v1105_v24  ;;  %v1701_v11 = vld [vmem:[#allocation2 + $0x400] sm:$0xff]  ;;  %v1694_v16 = vld [vmem:[#allocation2 + $0x3c8] sm:$0xff] }
 0x349   :  { %v1096_v18 = vpop.f32.mrf.mxu0  ;;  %v1611_v17 = vld [vmem:[#allocation2 + $0x380] sm:$0xff] }
 0x34a   :  { %v1106_v25 = vadd.f32 %v1096_v18, %v993_v23  ;;  %v1607_v24 = vld [vmem:[#allocation2 + $0x360] sm:$0xff] }
 0x34b   :  { %v2391_v19 = vpop.f32.mrf.mxu0 }
 0x34c   :  { %v1214_v31 = vadd.f32 %v1204_v3, %v1106_v25  ;;  %v1698_v3 = vld [vmem:[#allocation2 + $0x3e8] sm:$0xff]  ;;  %v1610_v19 = vld [vmem:[#allocation2 + $0x378] sm:$0xff] }
 0x34d   :  { %v1101_v20 = vpop.f32.mrf.mxu0 }
 0x34e   :  { %v1107_v30 = vadd.f32 %v1101_v20, %v998_v27  ;;  %v1605_v27 = vld [vmem:[#allocation2 + $0x350] sm:$0xff] }
 0x34f   :  { %v2394_v21 = vpop.f32.mrf.mxu0 }
 0x350   :  { %v1215_v38 = vadd.f32 %v1209_v15, %v1107_v30  ;;  %v1695_v15 = vld [vmem:[#allocation2 + $0x3d0] sm:$0xff]  ;;  %v1692_v30 = vld [vmem:[#allocation2 + $0x3b8] sm:$0xff] }
 0x351   :  { %v1609_v21 = vld [vmem:[#allocation2 + $0x370] sm:$0xff] }
 0x359   :  { %v1307_v26 = vpop.f32.mrf.mxu0 }
 0x35a   :  { %v1321_v32 = vadd.f32 %v1307_v26, %v1213_v28  ;;  %v1606_v26 = vld [vmem:[#allocation2 + $0x358] sm:$0xff]  ;;  %v1604_v28 = vld [vmem:[#allocation2 + $0x348] sm:$0xff] }
 0x35b   :  { %v2446_v29 = vpop.f32.mrf.mxu0 }
 0x35c   :  { %v1329_v39 = vadd.f32 %v1926_v34, %v1321_v32  ;;  %v1693_v29 = vld [vmem:[#allocation2 + $0x3c0] sm:$0xff]  ;;  %v1690_v32 = vld [vmem:[#allocation2 + $0x3a8] sm:$0xff] }
 0x35d   :  { %v1312_v33 = vpop.f32.mrf.mxu0 }
 0x35e   :  { %v1322_v35 = vadd.f32 %v1312_v33, %v1214_v31  ;;  %v1332_v45 = vmax.f32 %v1329_v39, 0.0  ;;  %v1691_v31 = vld [vmem:[#allocation2 + $0x3b0] sm:$0xff]  ;;  %v1689_v33 = vld [vmem:[#allocation2 + $0x3a0] sm:$0xff]  ;;  %v1791_v39 = vld [vmem:[#allocation2 + $0x478] sm:$0xff] }
 0x35f   :  { %v2449_v36 = vpop.f32.mrf.mxu0 }
 0x360   :  { %v1330_v37 = vadd.f32 %v1926_v34, %v1322_v35  ;;  %v1338_v49 = vrot.slane %v1332_v45, 1  ;;  %v1687_v35 = vld [vmem:[#allocation2 + $0x390] sm:$0xff] }
 0x361   :  { %v1317_v40 = vpop.f32.mrf.mxu0  ;;  %v1794_v36 = vld [vmem:[#allocation2 + $0x490] sm:$0xff] }
 0x362   :  { %v1323_v41 = vadd.f32 %v1317_v40, %v1215_v38  ;;  %v1333_v42 = vmax.f32 %v1330_v37, 0.0  ;;  %v1793_v37 = vld [vmem:[#allocation2 + $0x488] sm:$0xff]  ;;  %v1792_v38 = vld [vmem:[#allocation2 + $0x480] sm:$0xff]  ;;  %v1790_v40 = vld [vmem:[#allocation2 + $0x470] sm:$0xff] }
 0x363   :  { %v2452_v43 = vpop.f32.mrf.mxu0 }
 0x364   :  { %v1331_v44 = vadd.f32 %v1926_v34, %v1323_v41  ;;  %v1339_v47 = vrot.slane %v1333_v42, 1  ;;  %v1688_v34 = vld [vmem:[#allocation2 + $0x398] sm:$0xff]  ;;  %v1789_v41 = vld [vmem:[#allocation2 + $0x468] sm:$0xff] }
 0x365   :  { %v1787_v43 = vld [vmem:[#allocation2 + $0x458] sm:$0xff] }
 0x366   :  { %v1334_v46 = vmax.f32 %v1331_v44, 0.0  ;;  %v1340_v53 = vsel %vm651_vm2, %v1338_v49, %v1339_v47  ;;  %v1786_v44 = vld [vmem:[#allocation2 + $0x450] sm:$0xff] }
 0x367   :  { %v1346_v56 = vmax.f32 %v1332_v45, %v1340_v53  ;;  %v1785_v45 = vld [vmem:[#allocation2 + $0x448] sm:$0xff] }
 0x368   :  { %v1341_v48 = vrot.slane %v1334_v46, 1 }
 0x36a   :  { %v1348_v50 = vmax.f32 %v1334_v46, %v1341_v48  ;;  %v1342_v51 = vsel %vm651_vm2, %v1339_v47, %v1341_v48  ;;  %v1784_v46 = vld [vmem:[#allocation2 + $0x440] sm:$0xff]  ;;  %v1783_v47 = vld [vmem:[#allocation2 + $0x438] sm:$0xff]  ;;  %v1782_v48 = vld [vmem:[#allocation2 + $0x430] sm:$0xff] }
 0x36b   :  { %v1347_v52 = vmax.f32 %v1333_v42, %v1342_v51  ;;  %v1788_v42 = vld [vmem:[#allocation2 + $0x460] sm:$0xff]  ;;  %v1930_v51 = vld [vmem:[#allocation2 + $0x388] ss:$0 sm:$0xff] }
 0x36c   :  { %1356 = vrot.lane.b32.xlu1 %v1348_v50, %s2614_s8 }
 0x36d   :  { %1354 = vrot.lane.b32.xlu0 %v1347_v52, %s2614_s8 }
 0x370   :  { %1352 = vrot.lane.b32.xlu1 %v1346_v56, %s2614_s8 }
 0x3de   :  { %v1357_v63 = vpop.permute.xlu1 %1356 }
 0x3df   :  { %v1363_v1 = vmax.f32 %v1348_v50, %v1357_v63  ;;  %v1355_v2 = vpop.permute.xlu0 %1354 }
 0x3e0   :  { %v1362_v5 = vmax.f32 %v1347_v52, %v1355_v2  ;;  %v1935_v2 = vld [vmem:[#allocation2 + $0x498] ss:$0 sm:$0xff] }
 0x3e1   :  { %2454 = vmatpush3.msk.msra.mxu0 %vm1370_vm9, %v1363_v1 }
 0x3e2   :  { %2455 = vmatprep.subr.mxu0 %v2611_v0  ;;  %v1353_v6 = vpop.permute.xlu1 %1352 }
 0x3e3   :  { %v1361_v7 = vmax.f32 %v1346_v56, %v1353_v6  ;;  %2456 = vmatpush3.msra.mxu0 %v1362_v5 }
 0x3e4   :  { %2457 = vmatprep.subr.mxu0 %v2611_v0 }
 0x3e5   :  { %2458 = vmatpush3.msra.mxu0 %v1361_v7 }
 0x3e6   :  { %2460 = vmatmul.mubr.msk.f32.vlgmr.msra.gmra.mxu0 %vm1366_vm10, %v1365_v8  ;;  %2481 = vmatprep.subr.mxu0 %v2611_v0 }
 0x3e7   :  { %2482 = vmatpush3.msk.msra.mxu0 %vm1370_vm9, %v1363_v1  ;;  %2487 = vmatprep.mubr.msk.f32.mxu0 %vm2612_vm0, %v2611_v0 }
 0x3e8   :  { %2483 = vmatprep.subr.mxu0 %v2611_v0 }
 0x3e9   :  { %2484 = vmatpush3.msra.mxu0 %v1362_v5 }
 0x3ea   :  { %2485 = vmatprep.subr.mxu0 %v2611_v0 }
 0x3eb   :  { %2486 = vmatpush3.msra.mxu0 %v1361_v7 }
 0x3ec   :  { %2488 = vmatmul.mubr.msk.f32.vlgmr.msra.gmra.mxu0 %vm1366_vm10, %v1530_v9  ;;  %2509 = vmatprep.subr.mxu0 %v2611_v0 }
 0x3ed   :  { %2541 = vmatprep.mubr.msk.f32.mxu0 %vm2612_vm0, %v2611_v0  ;;  %2510 = vmatpush3.msra.mxu0 %v1702_v10 }
 0x3ee   :  { %2511 = vmatprep.subr.mxu0 %v2611_v0 }
 0x3ef   :  { %2512 = vmatpush3.msra.mxu0 %v1701_v11 }
 0x3f0   :  { %2513 = vmatprep.subr.mxu0 %v2611_v0 }
 0x3f1   :  { %2514 = vmatpush3.msra.mxu0 %v1700_v12 }
 0x3f2   :  { %2515 = vmatprep.subr.mxu0 %v2611_v0 }
 0x3f3   :  { %2516 = vmatpush3.msra.mxu0 %v1699_v13 }
 0x3f4   :  { %2517 = vmatprep.subr.mxu0 %v2611_v0 }
 0x3f5   :  { %2518 = vmatpush3.msra.mxu0 %v1698_v3 }
 0x3f6   :  { %2519 = vmatprep.subr.mxu0 %v2611_v0 }
 0x3f7   :  { %2520 = vmatpush3.msra.mxu0 %v1697_v4 }
 0x3f8   :  { %2521 = vmatprep.subr.mxu0 %v2611_v0 }
 0x3f9   :  { %2522 = vmatpush3.msra.mxu0 %v1696_v14 }
 0x3fa   :  { %2523 = vmatprep.subr.mxu0 %v2611_v0 }
 0x3fb   :  { %2524 = vmatpush3.msra.mxu0 %v1695_v15 }
 0x3fc   :  { %2525 = vmatprep.subr.mxu0 %v2611_v0 }
 0x3fd   :  { %2526 = vmatpush3.msra.mxu0 %v1694_v16 }
 0x3fe   :  { %2527 = vmatprep.subr.mxu0 %v2611_v0 }
 0x3ff   :  { %2528 = vmatpush3.msra.mxu0 %v1693_v29 }
 0x400   :  { %2529 = vmatprep.subr.mxu0 %v2611_v0 }
 0x401   :  { %2530 = vmatpush3.msra.mxu0 %v1692_v30 }
 0x402   :  { %2531 = vmatprep.subr.mxu0 %v2611_v0 }
 0x403   :  { %2532 = vmatpush3.msra.mxu0 %v1691_v31 }
 0x404   :  { %2533 = vmatprep.subr.mxu0 %v2611_v0 }
 0x405   :  { %2534 = vmatpush3.msra.mxu0 %v1690_v32 }
 0x406   :  { %2535 = vmatprep.subr.mxu0 %v2611_v0 }
 0x407   :  { %2536 = vmatpush3.msra.mxu0 %v1689_v33 }
 0x408   :  { %2537 = vmatprep.subr.mxu0 %v2611_v0 }
 0x409   :  { %2538 = vmatpush3.msra.mxu0 %v1688_v34 }
 0x40a   :  { %2539 = vmatprep.subr.mxu0 %v2611_v0 }
 0x40b   :  { %2540 = vmatpush3.msra.mxu0 %v1687_v35 }
 0x4a6   :  { %v1440_v18 = vpop.f32.mrf.mxu0 }
 0x4a7   :  { %2479 = vmatmul.mubr.msk.f32.vlgmr.msra.gmra.mxu1 %vm51_vm1, %v1440_v18 }
 0x4a8   :  { %2491 = vmatpush3.msra.mxu1 %v1611_v17  ;;  %v2461_v20 = vpop.f32.mrf.mxu0  ;;  %2506 = vmatprep.mubr.msk.f32.mxu1 %vm2612_vm0, %v2611_v0 }
 0x4a9   :  { %2492 = vmatprep.subr.mxu1 %v2611_v0 }
 0x4aa   :  { %2493 = vmatpush3.msra.mxu1 %v1610_v19 }
 0x4ab   :  { %2494 = vmatprep.subr.mxu1 %v2611_v0 }
 0x4ac   :  { %2495 = vmatpush3.msra.mxu1 %v1609_v21  ;;  %v1600_v23 = vpop.f32.mrf.mxu0 }
 0x4ad   :  { %2496 = vmatprep.subr.mxu1 %v2611_v0 }
 0x4ae   :  { %2497 = vmatpush3.msra.mxu1 %v1608_v22  ;;  %v2489_v25 = vpop.f32.mrf.mxu0 }
 0x4af   :  { %2498 = vmatprep.subr.mxu1 %v2611_v0 }
 0x4b0   :  { %2499 = vmatpush3.msra.mxu1 %v1607_v24 }
 0x4b1   :  { %2500 = vmatprep.subr.mxu1 %v2611_v0 }
 0x4b2   :  { %2501 = vmatpush3.msra.mxu1 %v1606_v26 }
 0x4b3   :  { %2502 = vmatprep.subr.mxu1 %v2611_v0 }
 0x4b4   :  { %2503 = vmatpush3.msra.mxu1 %v1605_v27 }
 0x4b5   :  { %2504 = vmatprep.subr.mxu1 %v2611_v0 }
 0x4b6   :  { %2505 = vmatpush3.msra.mxu1 %v1604_v28 }
 0x4b7   :  { %2507 = vmatmul.mubr.msk.f32.vlgmr.msra.gmra.mxu1 %vm51_vm1, %v1600_v23  ;;  %2544 = vmatprep.subr.mxu1 %v2611_v0 }
 0x4b8   :  { %2576 = vmatprep.mubr.msk.f32.mxu1 %vm2612_vm0, %v2611_v0  ;;  %2545 = vmatpush3.msra.mxu1 %v1794_v36 }
 0x4b9   :  { %2546 = vmatprep.subr.mxu1 %v2611_v0 }
 0x4ba   :  { %2547 = vmatpush3.msra.mxu1 %v1793_v37 }
 0x4bb   :  { %2548 = vmatprep.subr.mxu1 %v2611_v0 }
 0x4bc   :  { %2549 = vmatpush3.msra.mxu1 %v1792_v38 }
 0x4bd   :  { %2550 = vmatprep.subr.mxu1 %v2611_v0 }
 0x4be   :  { %2551 = vmatpush3.msra.mxu1 %v1791_v39 }
 0x4bf   :  { %2552 = vmatprep.subr.mxu1 %v2611_v0 }
 0x4c0   :  { %2553 = vmatpush3.msra.mxu1 %v1790_v40 }
 0x4c1   :  { %2554 = vmatprep.subr.mxu1 %v2611_v0 }
 0x4c2   :  { %2555 = vmatpush3.msra.mxu1 %v1789_v41 }
 0x4c3   :  { %2556 = vmatprep.subr.mxu1 %v2611_v0 }
 0x4c4   :  { %2557 = vmatpush3.msra.mxu1 %v1788_v42 }
 0x4c5   :  { %2558 = vmatprep.subr.mxu1 %v2611_v0 }
 0x4c6   :  { %2559 = vmatpush3.msra.mxu1 %v1787_v43 }
 0x4c7   :  { %2560 = vmatprep.subr.mxu1 %v2611_v0 }
 0x4c8   :  { %2561 = vmatpush3.msra.mxu1 %v1786_v44 }
 0x4c9   :  { %2562 = vmatprep.subr.mxu1 %v2611_v0 }
 0x4ca   :  { %2563 = vmatpush3.msra.mxu1 %v1785_v45 }
 0x4cb   :  { %2564 = vmatprep.subr.mxu1 %v2611_v0 }
 0x4cc   :  { %2565 = vmatpush3.msra.mxu1 %v1784_v46 }
 0x4cd   :  { %2566 = vmatprep.subr.mxu1 %v2611_v0 }
 0x4ce   :  { %2567 = vmatpush3.msra.mxu1 %v1783_v47 }
 0x4cf   :  { %2568 = vmatprep.subr.mxu1 %v2611_v0 }
 0x4d0   :  { %2569 = vmatpush3.msra.mxu1 %v1782_v48 }
 0x4d1   :  { %2570 = vmatprep.subr.mxu1 %v2611_v0 }
 0x4d2   :  { %2571 = vmatpush3.msra.mxu1 %v1781_v57 }
 0x4d3   :  { %2572 = vmatprep.subr.mxu1 %v2611_v0 }
 0x4d4   :  { %2573 = vmatpush3.msra.mxu1 %v1780_v58 }
 0x4d5   :  { %2574 = vmatprep.subr.mxu1 %v2611_v0 }
 0x4d6   :  { %2575 = vmatpush3.msra.mxu1 %v1779_v59 }
 0x567   :  { %v1521_v49 = vpop.f32.mrf.mxu1 }
 0x568   :  { %v1529_v52 = vadd.f32 %v1930_v51, %v1521_v49 }
 0x569   :  { %v2480_v50 = vpop.f32.mrf.mxu1 }
 0x577   :  { %v1681_v53 = vpop.f32.mrf.mxu1 }
 0x578   :  { %v1685_v54 = vadd.f32 %v1681_v53, %v1529_v52 }
 0x579   :  { %v2508_v55 = vpop.f32.mrf.mxu1 }
 0x57a   :  { %v1686_v56 = vmax.f32 %v1685_v54, 0.0 }
 0x57c   :  { %2542 = vmatmul.mubr.f32.vlgmr.msra.gmra.mxu0 %v1686_v56 }
 0x63c   :  { %v1774_v61 = vpop.f32.mrf.mxu0 }
 0x63d   :  { %v1775_v62 = vadd.f32 %v1934_v60, %v1774_v61 }
 0x63e   :  { %v2543_v63 = vpop.f32.mrf.mxu0 }
 0x63f   :  { %v1778_v1 = vmax.f32 %v1775_v62, 0.0 }
 0x641   :  { %2577 = vmatmul.mubr.f32.vlgmr.msra.gmra.mxu1 %v1778_v1 }
 0x701   :  { %v1866_v5 = vpop.f32.mrf.mxu1 }
 0x702   :  { %v1867_v6 = vadd.f32 %v1935_v2, %v1866_v5 }
 0x703   :  { %v2578_v7 = vpop.f32.mrf.mxu1 }
 0x704   :  { %1870 = vst [vmem:[%s3043_s2] sm:$0xff] %v1867_v6 }
 0x705   :  { %1875 = vsyncpa [#allocation3], 1 }

</bundles_post_ra>
